<compile_context>
chip_gen: v7x
topology: tpu7x:2x2x1
jax: 0.10.0
libtpu: 0.0.40
codegen_flags: <defaults>
</compile_context>

<pallas_src>
import jax
import jax.numpy as jnp
from jax.experimental import pallas as pl
from jax.experimental.pallas import tpu as pltpu


def decoder_rnn_kernel(
    # per-timestep input (block sliced along the grid axis)
    emb_ref,                                 # (1, B, E)  embedding of captions[:, t]
    # loop-invariant inputs (constant index_map -> DMA'd once, VMEM-resident)
    x_ref,                                   # (B, L, E)  image features, channels-last
    wia_ref, wib_ref, whh_ref, blstm_ref,    # LSTMCell: (E,4H) (E,4H) (H,4H) (1,4H)
    w1_ref, b1_ref,                          # linear_feats  Conv1d(E->H, k=1)
    w2_ref, b2_ref,                          # embed_feats   Conv1d(H->H, k=1)
    w3_ref, b3_ref,                          # linear_hidden Linear(H->H)
    w4_ref, b4_ref,                          # embed_hidden  Linear(H->H)
    wc_ref,                                  # att_coeffs    Conv1d(H->1, k=1) weight (1,H)
    w5_ref, b5_ref,                          # linear_out    Linear(H->H)
    wl_ref, bl_ref,                          # output Linear(H -> V-1)
    # output
    out_ref,                                 # (1, B, V-1) vocab logits for this step
    # VMEM scratch (persists across the T grid steps)
    h_sc, c_sc,                              # (B, H) LSTM hidden / cell state
    inp_sc,                                  # (B, E) recurrent input_feat
    feats_sc,                                # (B, L, H) linear_feats output (invariant)
    fe_sc,                                   # (B, L, H) embed_feats output (invariant)
):
    f32, bf16 = jnp.float32, jnp.bfloat16
    B, L, H = feats_sc.shape
    E = x_ref.shape[-1]
    t = pl.program_id(0)

    def bdot(a, b):
        # bf16 operands + f32 accumulation: single-pass MXU matmul (instead of
        # the 6-pass f32 "highest" decomposition).  Element-wise math stays f32.
        return jnp.dot(a.astype(bf16), b.astype(bf16), preferred_element_type=f32)

    @pl.when(t == 0)
    def _init():
        x = x_ref[...]                                             # (B, L, E) f32
        h_sc[...] = jnp.zeros_like(h_sc)                           # states = None
        c_sc[...] = jnp.zeros_like(c_sc)
        inp_sc[...] = jnp.mean(x, axis=1)                          # avg_feats (B, E)
        # Hoisted feature path (depends only on x and weights): compute once at
        # step 0 and keep it VMEM-resident for every decode step.
        x2 = x.reshape(B * L, E)
        feats = jnp.maximum(bdot(x2, w1_ref[...]) + b1_ref[...], 0.0)   # ReLU
        fe = bdot(feats, w2_ref[...]) + b2_ref[...]
        feats_sc[...] = feats.reshape(B, L, H)
        fe_sc[...] = fe.reshape(B, L, H)

    # ---- LSTMCell: cat(input_feat, prev_word) folded into two input matmuls.
    prev = emb_ref[0]                                              # (B, E)
    gates = (bdot(inp_sc[...], wia_ref[...])
             + bdot(prev, wib_ref[...])
             + bdot(h_sc[...], whh_ref[...])
             + blstm_ref[...])                                     # (B, 4H) f32
    sig = lambda z: 1.0 / (1.0 + jnp.exp(-z))
    i_g = sig(gates[:, 0 * H:1 * H])
    f_g = sig(gates[:, 1 * H:2 * H])
    g_g = jnp.tanh(gates[:, 2 * H:3 * H])
    o_g = sig(gates[:, 3 * H:4 * H])
    c_new = f_g * c_sc[...] + i_g * g_g
    h_new = o_g * jnp.tanh(c_new)
    c_sc[...] = c_new
    h_sc[...] = h_new

    # ---- AttentionLayer (per-batch softmax over L; no O(B^2 L) logits).
    h1 = jnp.tanh(bdot(h_new, w3_ref[...]) + b3_ref[...])          # (B, H)
    h_emb = bdot(h1, w4_ref[...]) + b4_ref[...]                    # (B, H)
    merged = jnp.tanh(fe_sc[...] + h_emb[:, None, :])              # (B, L, H)
    # att_coeffs Conv1d(H->1): lane reduce; bias dropped (softmax shift-invariant).
    logit = jnp.sum(merged * wc_ref[...], axis=-1, keepdims=True)  # (B, L, 1)
    logit = jnp.broadcast_to(logit, (B, L, H))                     # lane-broadcast
    m = jnp.max(logit, axis=1, keepdims=True)                      # (B, 1, H)
    e = jnp.exp(logit - m)                                         # f32 softmax over L
    att = e / jnp.sum(e, axis=1, keepdims=True)                    # (B, L, H)
    v = jnp.sum(att * feats_sc[...], axis=1) + h1                  # context + residual
    att_out = jnp.tanh(bdot(v, w5_ref[...]) + b5_ref[...])         # (B, H): "v" in DecoderRNN

    # Recurrent carry + vocab projection for this timestep.
    # TODO(synk): training-mode dropout on att_out before the vocab projection
    # (pltpu.prng_seed + pltpu.stateful_bernoulli); inference mode is identity.
    inp_sc[...] = att_out
    out_ref[0] = bdot(att_out, wl_ref[...]) + bl_ref[...]          # (B, V-1), lane-dense


def decoder_rnn_pallas(features_ncl, captions, params):
    """DecoderRNN.forward (inference): features (B, E, L) NCL, captions (B, T)."""
    embed_tbl, (w_ih, w_hh, b_ih, b_hh), att_p, (wl, bl) = params
    (w1, b1), (w2, b2), (w3, b3), (w4, b4), (wc, bc), (w5, b5) = att_p
    del bc  # softmax over L is shift-invariant -> the att_coeffs bias is a no-op

    B, E, L = features_ncl.shape
    H = w_hh.shape[1]
    T = captions.shape[1]
    Vm1 = wl.shape[0]
    assert E == H, "module feeds the attention output back as LSTM input -> E == H"
    bf16 = jnp.bfloat16

    # One-time XLA-side layout plumbing: channels-last features, embedding
    # lookup, and timestep-major embeddings so the grid slices one step at a time.
    x_cl = jnp.transpose(features_ncl, (0, 2, 1))                  # (B, L, E)
    emb_seq = jnp.transpose(embed_tbl[captions], (1, 0, 2))        # (T, B, E)

    # Weights pre-transposed to (in, out); matmul operands in bf16 (half the
    # weight DMA bytes, 1-pass MXU); biases / element-wise weights stay f32.
    wia = jnp.asarray(w_ih[:, :E].T, bf16)          # input_feat half of W_ih
    wib = jnp.asarray(w_ih[:, E:].T, bf16)          # prev_word half of W_ih
    whh = jnp.asarray(w_hh.T, bf16)
    blstm = (b_ih + b_hh).reshape(1, -1)
    w1t, w2t, w3t, w4t, w5t = (jnp.asarray(w.T, bf16) for w in (w1, w2, w3, w4, w5))
    b1r, b2r, b3r, b4r, b5r = (b.reshape(1, -1) for b in (b1, b2, b3, b4, b5))
    wcr = wc.reshape(1, H)
    wlt = jnp.asarray(wl.T, bf16)
    blr = bl.reshape(1, -1)

    def resident(a):
        # Loop-invariant operand: constant block index -> Pallas DMAs it once
        # and keeps it VMEM-resident across all T grid steps.
        idx = (0,) * a.ndim
        return pl.BlockSpec(a.shape, lambda t: idx)

    outs_tbv = pl.pallas_call(
        decoder_rnn_kernel,
        grid=(T,),
        in_specs=[
            pl.BlockSpec((1, B, E), lambda t: (t, 0, 0)),          # current-step embeddings
            resident(x_cl),
            resident(wia), resident(wib), resident(whh), resident(blstm),
            resident(w1t), resident(b1r), resident(w2t), resident(b2r),
            resident(w3t), resident(b3r), resident(w4t), resident(b4r),
            resident(wcr), resident(w5t), resident(b5r),
            resident(wlt), resident(blr),
        ],
        out_specs=pl.BlockSpec((1, B, Vm1), lambda t: (t, 0, 0)),
        out_shape=jax.ShapeDtypeStruct((T, B, Vm1), jnp.float32),
        scratch_shapes=[
            pltpu.VMEM((B, H), jnp.float32),        # h
            pltpu.VMEM((B, H), jnp.float32),        # c
            pltpu.VMEM((B, E), jnp.float32),        # recurrent input_feat
            pltpu.VMEM((B, L, H), jnp.float32),     # linear_feats output
            pltpu.VMEM((B, L, H), jnp.float32),     # embed_feats output
        ],
        # Timestep axis is a true recurrence -> "arbitrary".
        # TODO(synk): for v7x (2 TCs) add a leading "parallel" batch-chunk grid
        # axis once B grows, and set vmem_limit_bytes explicitly when scaling to
        # the real H~512 / resident-feature sizes (64 MiB VMEM on v7x).
        compiler_params=pltpu.CompilerParams(dimension_semantics=("arbitrary",)),
    )(emb_seq, x_cl, wia, wib, whh, blstm,
      w1t, b1r, w2t, b2r, w3t, b3r, w4t, b4r,
      wcr, w5t, b5r, wlt, blr)

    outs = jnp.transpose(outs_tbv, (1, 0, 2))                      # (B, T, V-1)
    sampled_ids = jnp.argmax(outs, axis=-1)                        # greedy `o.max(1)` per step
    return outs, sampled_ids


def decoder_rnn_reference(features_ncl, captions, params):
    """Pure-JAX replica of DecoderRNN.forward (inference), using the same matmul
    contract as the kernel (bf16 operands, f32 accumulation) for verification."""
    embed_tbl, (w_ih, w_hh, b_ih, b_hh), att_p, (wl, bl) = params
    (w1, b1), (w2, b2), (w3, b3), (w4, b4), (wc, bc), (w5, b5) = att_p
    f32, bf16 = jnp.float32, jnp.bfloat16

    def bdot(a, b):
        return jnp.dot(a.astype(bf16), b.astype(bf16), preferred_element_type=f32)

    sig = lambda z: 1.0 / (1.0 + jnp.exp(-z))
    B, E, L = features_ncl.shape
    H = w_hh.shape[1]
    T = captions.shape[1]
    x_cl = jnp.transpose(features_ncl, (0, 2, 1))                  # (B, L, E)
    emb = embed_tbl[captions]                                      # (B, T, E)

    feats = jax.nn.relu(bdot(x_cl.reshape(B * L, E), w1.T) + b1).reshape(B, L, H)
    fe = (bdot(feats.reshape(B * L, H), w2.T) + b2).reshape(B, L, H)

    h = jnp.zeros((B, H), f32)
    c = jnp.zeros((B, H), f32)
    input_feat = jnp.mean(features_ncl, axis=-1)                   # avg_feats
    outs, ids = [], []
    for t in range(T):
        xin = jnp.concatenate([input_feat, emb[:, t]], axis=1)     # (B, 2E)
        gates = bdot(xin, w_ih.T) + b_ih + bdot(h, w_hh.T) + b_hh
        i_g = sig(gates[:, 0 * H:1 * H])
        f_g = sig(gates[:, 1 * H:2 * H])
        g_g = jnp.tanh(gates[:, 2 * H:3 * H])
        o_g = sig(gates[:, 3 * H:4 * H])
        c = f_g * c + i_g * g_g
        h = o_g * jnp.tanh(c)

        h1 = jnp.tanh(bdot(h, w3.T) + b3)
        h_emb = bdot(h1, w4.T) + b4
        merged = jnp.tanh(fe + h_emb[:, None, :])
        logits = jnp.sum(merged * wc[0], axis=-1) + bc[0]          # (B, L), incl. bias
        att = jax.nn.softmax(logits, axis=-1)
        v = jnp.sum(att[:, :, None] * feats, axis=1) + h1
        att_out = jnp.tanh(bdot(v, w5.T) + b5)

        o = bdot(att_out, wl.T) + bl                               # (B, V-1)
        outs.append(o)
        ids.append(jnp.argmax(o, axis=-1))
        input_feat = att_out
    return jnp.stack(outs, axis=1), jnp.stack(ids, axis=1)


def make_params(key, vocab_size, embed_size, hidden_size):
    E, H, V = embed_size, hidden_size, vocab_size
    ks = jax.random.split(key, 19)
    n = lambda k, shape, s=0.1: s * jax.random.normal(k, shape, jnp.float32)
    embed_tbl = n(ks[0], (V, E), 1.0)
    lstm = (n(ks[1], (4 * H, 2 * E)), n(ks[2], (4 * H, H)),
            n(ks[3], (4 * H,)), n(ks[4], (4 * H,)))
    att = [(n(ks[5], (H, E)), n(ks[6], (H,))),        # linear_feats
           (n(ks[7], (H, H)), n(ks[8], (H,))),        # embed_feats
           (n(ks[9], (H, H)), n(ks[10], (H,))),       # linear_hidden
           (n(ks[11], (H, H)), n(ks[12], (H,))),      # embed_hidden
           (n(ks[13], (1, H)), n(ks[14], (1,))),      # att_coeffs
           (n(ks[15], (H, H)), n(ks[16], (H,)))]      # linear_out
    out_lin = (n(ks[17], (V - 1, H), 0.3), n(ks[18], (V - 1,), 0.3))
    return embed_tbl, lstm, att, out_lin


if __name__ == "__main__":
    B, E, H, L, T, V = 2, 32, 32, 16, 6, 129          # V-1 = 128 -> lane-dense logits
    key = jax.random.PRNGKey(0)
    k_feat, k_cap, k_par = jax.random.split(key, 3)

    features = jax.random.normal(k_feat, (B, E, L), jnp.float32)   # PyTorch NCL layout
    captions = jax.random.randint(k_cap, (B, T), 0, V)
    params = make_params(k_par, V, E, H)

    outs, ids = decoder_rnn_pallas(features, captions, params)
    outs = jax.block_until_ready(outs)
    ids = jax.block_until_ready(ids)

    outs_ref, ids_ref = decoder_rnn_reference(features, captions, params)
    assert outs.shape == (B, T, V - 1) and ids.shape == (B, T)
    assert jnp.allclose(outs, outs_ref, atol=1e-2, rtol=1e-2), (
        float(jnp.max(jnp.abs(outs - outs_ref))))
    # Greedy ids derive from outs (o.max(1)); under the bf16 matmul contract a
    # near-tie could legitimately flip, so require high (not exact) agreement.
    assert float(jnp.mean((ids == ids_ref).astype(jnp.float32))) >= 0.8

    print("KERNEL_OK")
</pallas_src>

<mosaic_0001>
module attributes {stable_mosaic.version = 11 : i64} {
  func.func @decoder_rnn_kernel(%arg0: i32, %arg1: memref<1x2x32xf32, #tpu.memory_space<vmem>>, %arg2: memref<2x16x32xf32, #tpu.memory_space<vmem>>, %arg3: memref<32x128xbf16, #tpu.memory_space<vmem>>, %arg4: memref<32x128xbf16, #tpu.memory_space<vmem>>, %arg5: memref<32x128xbf16, #tpu.memory_space<vmem>>, %arg6: memref<1x128xf32, #tpu.memory_space<vmem>>, %arg7: memref<32x32xbf16, #tpu.memory_space<vmem>>, %arg8: memref<1x32xf32, #tpu.memory_space<vmem>>, %arg9: memref<32x32xbf16, #tpu.memory_space<vmem>>, %arg10: memref<1x32xf32, #tpu.memory_space<vmem>>, %arg11: memref<32x32xbf16, #tpu.memory_space<vmem>>, %arg12: memref<1x32xf32, #tpu.memory_space<vmem>>, %arg13: memref<32x32xbf16, #tpu.memory_space<vmem>>, %arg14: memref<1x32xf32, #tpu.memory_space<vmem>>, %arg15: memref<1x32xf32, #tpu.memory_space<vmem>>, %arg16: memref<32x32xbf16, #tpu.memory_space<vmem>>, %arg17: memref<1x32xf32, #tpu.memory_space<vmem>>, %arg18: memref<32x128xbf16, #tpu.memory_space<vmem>>, %arg19: memref<1x128xf32, #tpu.memory_space<vmem>>, %arg20: memref<1x2x128xf32, #tpu.memory_space<vmem>>, %arg21: memref<2x32xf32, #tpu.memory_space<vmem>>, %arg22: memref<2x32xf32, #tpu.memory_space<vmem>>, %arg23: memref<2x32xf32, #tpu.memory_space<vmem>>, %arg24: memref<2x16x32xf32, #tpu.memory_space<vmem>>, %arg25: memref<2x16x32xf32, #tpu.memory_space<vmem>>) attributes {dimension_semantics = [#tpu.dimension_semantics<arbitrary>], iteration_bounds = array<i64: 6>, scalar_prefetch = 0 : i64, scratch_operands = 5 : i64, tpu.core_type = #tpu.core_type<tc>, window_params = [{transform_indices = @transform_0, window_bounds = array<i64: 1, 2, 32>}, {pipeline_mode = #tpu.pipeline_mode<synchronous>, transform_indices = @transform_1, window_bounds = array<i64: 2, 16, 32>}, {pipeline_mode = #tpu.pipeline_mode<synchronous>, transform_indices = @transform_2, window_bounds = array<i64: 32, 128>}, {pipeline_mode = #tpu.pipeline_mode<synchronous>, transform_indices = @transform_3, window_bounds = array<i64: 32, 128>}, {pipeline_mode = #tpu.pipeline_mode<synchronous>, transform_indices = @transform_4, window_bounds = array<i64: 32, 128>}, {pipeline_mode = #tpu.pipeline_mode<synchronous>, transform_indices = @transform_5, window_bounds = array<i64: 1, 128>}, {pipeline_mode = #tpu.pipeline_mode<synchronous>, transform_indices = @transform_6, window_bounds = array<i64: 32, 32>}, {pipeline_mode = #tpu.pipeline_mode<synchronous>, transform_indices = @transform_7, window_bounds = array<i64: 1, 32>}, {pipeline_mode = #tpu.pipeline_mode<synchronous>, transform_indices = @transform_8, window_bounds = array<i64: 32, 32>}, {pipeline_mode = #tpu.pipeline_mode<synchronous>, transform_indices = @transform_9, window_bounds = array<i64: 1, 32>}, {pipeline_mode = #tpu.pipeline_mode<synchronous>, transform_indices = @transform_10, window_bounds = array<i64: 32, 32>}, {pipeline_mode = #tpu.pipeline_mode<synchronous>, transform_indices = @transform_11, window_bounds = array<i64: 1, 32>}, {pipeline_mode = #tpu.pipeline_mode<synchronous>, transform_indices = @transform_12, window_bounds = array<i64: 32, 32>}, {pipeline_mode = #tpu.pipeline_mode<synchronous>, transform_indices = @transform_13, window_bounds = array<i64: 1, 32>}, {pipeline_mode = #tpu.pipeline_mode<synchronous>, transform_indices = @transform_14, window_bounds = array<i64: 1, 32>}, {pipeline_mode = #tpu.pipeline_mode<synchronous>, transform_indices = @transform_15, window_bounds = array<i64: 32, 32>}, {pipeline_mode = #tpu.pipeline_mode<synchronous>, transform_indices = @transform_16, window_bounds = array<i64: 1, 32>}, {pipeline_mode = #tpu.pipeline_mode<synchronous>, transform_indices = @transform_17, window_bounds = array<i64: 32, 128>}, {pipeline_mode = #tpu.pipeline_mode<synchronous>, transform_indices = @transform_18, window_bounds = array<i64: 1, 128>}, {transform_indices = @transform_19, window_bounds = array<i64: 1, 2, 128>}]} {
    %c0_i32 = arith.constant 0 : i32
    %0 = arith.cmpi eq, %arg0, %c0_i32 : i32
    %1 = arith.extui %0 : i1 to i32
    %c0_i32_0 = arith.constant 0 : i32
    %2 = arith.cmpi ne, %1, %c0_i32_0 : i32
    scf.if %2 {
      %c0_69 = arith.constant 0 : index
      %c0_70 = arith.constant 0 : index
      %c0_71 = arith.constant 0 : index
      %111 = vector.load %arg2[%c0_69, %c0_70, %c0_71] : memref<2x16x32xf32, #tpu.memory_space<vmem>>, vector<2x16x32xf32>
      %cst_72 = arith.constant 0.000000e+00 : f32
      %112 = vector.broadcast %cst_72 : f32 to vector<2x32xf32>
      %c0_73 = arith.constant 0 : index
      %c0_74 = arith.constant 0 : index
      %113 = vector.load %arg21[%c0_73, %c0_74] : memref<2x32xf32, #tpu.memory_space<vmem>>, vector<2x32xf32>
      tpu.vector_store %arg21[%c0_73, %c0_74], %112 {strides = array<i32>} : memref<2x32xf32, #tpu.memory_space<vmem>>, vector<2x32xf32>,
      %cst_75 = arith.constant 0.000000e+00 : f32
      %114 = vector.broadcast %cst_75 : f32 to vector<2x32xf32>
      %c0_76 = arith.constant 0 : index
      %c0_77 = arith.constant 0 : index
      %115 = vector.load %arg22[%c0_76, %c0_77] : memref<2x32xf32, #tpu.memory_space<vmem>>, vector<2x32xf32>
      tpu.vector_store %arg22[%c0_76, %c0_77], %114 {strides = array<i32>} : memref<2x32xf32, #tpu.memory_space<vmem>>, vector<2x32xf32>,
      %cst_78 = arith.constant dense<0.000000e+00> : vector<2x32xf32>
      %116 = vector.multi_reduction <add>, %111, %cst_78 [1] : vector<2x16x32xf32> to vector<2x32xf32>
      %cst_79 = arith.constant 1.600000e+01 : f32
      %117 = vector.broadcast %cst_79 : f32 to vector<2x32xf32>
      %118 = arith.divf %116, %117 : vector<2x32xf32>
      %c0_80 = arith.constant 0 : index
      %c0_81 = arith.constant 0 : index
      %119 = vector.load %arg23[%c0_80, %c0_81] : memref<2x32xf32, #tpu.memory_space<vmem>>, vector<2x32xf32>
      tpu.vector_store %arg23[%c0_80, %c0_81], %118 {strides = array<i32>} : memref<2x32xf32, #tpu.memory_space<vmem>>, vector<2x32xf32>,
      %120 = vector.shape_cast %111 : vector<2x16x32xf32> to vector<32x32xf32>
      %c0_82 = arith.constant 0 : index
      %c0_83 = arith.constant 0 : index
      %121 = vector.load %arg7[%c0_82, %c0_83] : memref<32x32xbf16, #tpu.memory_space<vmem>>, vector<32x32xbf16>
      %122 = arith.truncf %120 : vector<32x32xf32> to vector<32x32xbf16>
      %cst_84 = arith.constant dense<0.000000e+00> : vector<32x32xf32>
      %123 = tpu.matmul %122, %121, %cst_84 {dimension_numbers = #tpu.dot_dimension_numbers<[1], [0], [0], [1], [0, 0, 1, 1], [], []>} : vector<32x32xbf16>, vector<32x32xbf16>, vector<32x32xf32> -> vector<32x32xf32>
      %c0_85 = arith.constant 0 : index
      %c0_86 = arith.constant 0 : index
      %124 = vector.load %arg8[%c0_85, %c0_86] : memref<1x32xf32, #tpu.memory_space<vmem>>, vector<1x32xf32>
      %125 = vector.broadcast %124 : vector<1x32xf32> to vector<32x32xf32>
      %126 = arith.addf %123, %125 : vector<32x32xf32>
      %cst_87 = arith.constant 0.000000e+00 : f32
      %127 = vector.broadcast %cst_87 : f32 to vector<32x32xf32>
      %128 = arith.maximumf %126, %127 : vector<32x32xf32>
      %c0_88 = arith.constant 0 : index
      %c0_89 = arith.constant 0 : index
      %129 = vector.load %arg9[%c0_88, %c0_89] : memref<32x32xbf16, #tpu.memory_space<vmem>>, vector<32x32xbf16>
      %130 = arith.truncf %128 : vector<32x32xf32> to vector<32x32xbf16>
      %cst_90 = arith.constant dense<0.000000e+00> : vector<32x32xf32>
      %131 = tpu.matmul %130, %129, %cst_90 {dimension_numbers = #tpu.dot_dimension_numbers<[1], [0], [0], [1], [0, 0, 1, 1], [], []>} : vector<32x32xbf16>, vector<32x32xbf16>, vector<32x32xf32> -> vector<32x32xf32>
      %c0_91 = arith.constant 0 : index
      %c0_92 = arith.constant 0 : index
      %132 = vector.load %arg10[%c0_91, %c0_92] : memref<1x32xf32, #tpu.memory_space<vmem>>, vector<1x32xf32>
      %133 = vector.broadcast %132 : vector<1x32xf32> to vector<32x32xf32>
      %134 = arith.addf %131, %133 : vector<32x32xf32>
      %135 = vector.shape_cast %128 : vector<32x32xf32> to vector<2x16x32xf32>
      %c0_93 = arith.constant 0 : index
      %c0_94 = arith.constant 0 : index
      %c0_95 = arith.constant 0 : index
      %136 = vector.load %arg24[%c0_93, %c0_94, %c0_95] : memref<2x16x32xf32, #tpu.memory_space<vmem>>, vector<2x16x32xf32>
      tpu.vector_store %arg24[%c0_93, %c0_94, %c0_95], %135 {strides = array<i32>} : memref<2x16x32xf32, #tpu.memory_space<vmem>>, vector<2x16x32xf32>,
      %137 = vector.shape_cast %134 : vector<32x32xf32> to vector<2x16x32xf32>
      %c0_96 = arith.constant 0 : index
      %c0_97 = arith.constant 0 : index
      %c0_98 = arith.constant 0 : index
      %138 = vector.load %arg25[%c0_96, %c0_97, %c0_98] : memref<2x16x32xf32, #tpu.memory_space<vmem>>, vector<2x16x32xf32>
      tpu.vector_store %arg25[%c0_96, %c0_97, %c0_98], %137 {strides = array<i32>} : memref<2x16x32xf32, #tpu.memory_space<vmem>>, vector<2x16x32xf32>,
    } else {
    }
    %c0 = arith.constant 0 : index
    %c0_1 = arith.constant 0 : index
    %c0_2 = arith.constant 0 : index
    %3 = vector.load %arg1[%c0, %c0_1, %c0_2] : memref<1x2x32xf32, #tpu.memory_space<vmem>>, vector<1x2x32xf32>
    %4 = vector.shape_cast %3 : vector<1x2x32xf32> to vector<2x32xf32>
    %c0_3 = arith.constant 0 : index
    %c0_4 = arith.constant 0 : index
    %5 = vector.load %arg23[%c0_3, %c0_4] : memref<2x32xf32, #tpu.memory_space<vmem>>, vector<2x32xf32>
    %c0_5 = arith.constant 0 : index
    %c0_6 = arith.constant 0 : index
    %6 = vector.load %arg3[%c0_5, %c0_6] : memref<32x128xbf16, #tpu.memory_space<vmem>>, vector<32x128xbf16>
    %7 = arith.truncf %5 : vector<2x32xf32> to vector<2x32xbf16>
    %cst = arith.constant dense<0.000000e+00> : vector<2x128xf32>
    %8 = tpu.matmul %7, %6, %cst {dimension_numbers = #tpu.dot_dimension_numbers<[1], [0], [0], [1], [0, 0, 1, 1], [], []>} : vector<2x32xbf16>, vector<32x128xbf16>, vector<2x128xf32> -> vector<2x128xf32>
    %c0_7 = arith.constant 0 : index
    %c0_8 = arith.constant 0 : index
    %9 = vector.load %arg4[%c0_7, %c0_8] : memref<32x128xbf16, #tpu.memory_space<vmem>>, vector<32x128xbf16>
    %10 = arith.truncf %4 : vector<2x32xf32> to vector<2x32xbf16>
    %cst_9 = arith.constant dense<0.000000e+00> : vector<2x128xf32>
    %11 = tpu.matmul %10, %9, %cst_9 {dimension_numbers = #tpu.dot_dimension_numbers<[1], [0], [0], [1], [0, 0, 1, 1], [], []>} : vector<2x32xbf16>, vector<32x128xbf16>, vector<2x128xf32> -> vector<2x128xf32>
    %12 = arith.addf %8, %11 : vector<2x128xf32>
    %c0_10 = arith.constant 0 : index
    %c0_11 = arith.constant 0 : index
    %13 = vector.load %arg21[%c0_10, %c0_11] : memref<2x32xf32, #tpu.memory_space<vmem>>, vector<2x32xf32>
    %c0_12 = arith.constant 0 : index
    %c0_13 = arith.constant 0 : index
    %14 = vector.load %arg5[%c0_12, %c0_13] : memref<32x128xbf16, #tpu.memory_space<vmem>>, vector<32x128xbf16>
    %15 = arith.truncf %13 : vector<2x32xf32> to vector<2x32xbf16>
    %cst_14 = arith.constant dense<0.000000e+00> : vector<2x128xf32>
    %16 = tpu.matmul %15, %14, %cst_14 {dimension_numbers = #tpu.dot_dimension_numbers<[1], [0], [0], [1], [0, 0, 1, 1], [], []>} : vector<2x32xbf16>, vector<32x128xbf16>, vector<2x128xf32> -> vector<2x128xf32>
    %17 = arith.addf %12, %16 : vector<2x128xf32>
    %c0_15 = arith.constant 0 : index
    %c0_16 = arith.constant 0 : index
    %18 = vector.load %arg6[%c0_15, %c0_16] : memref<1x128xf32, #tpu.memory_space<vmem>>, vector<1x128xf32>
    %19 = vector.broadcast %18 : vector<1x128xf32> to vector<2x128xf32>
    %20 = arith.addf %17, %19 : vector<2x128xf32>
    %21 = vector.extract_strided_slice %20 {offsets = [0, 0], sizes = [2, 32], strides = [1, 1]} : vector<2x128xf32> to vector<2x32xf32>
    %cst_17 = arith.constant 0.000000e+00 : f32
    %22 = vector.broadcast %cst_17 : f32 to vector<2x32xf32>
    %23 = arith.subf %22, %21 : vector<2x32xf32>
    %24 = math.exp %23 : vector<2x32xf32>
    %cst_18 = arith.constant 1.000000e+00 : f32
    %25 = vector.broadcast %cst_18 : f32 to vector<2x32xf32>
    %26 = arith.addf %25, %24 : vector<2x32xf32>
    %cst_19 = arith.constant 1.000000e+00 : f32
    %27 = vector.broadcast %cst_19 : f32 to vector<2x32xf32>
    %28 = arith.divf %27, %26 : vector<2x32xf32>
    %29 = vector.extract_strided_slice %20 {offsets = [0, 32], sizes = [2, 32], strides = [1, 1]} : vector<2x128xf32> to vector<2x32xf32>
    %cst_20 = arith.constant 0.000000e+00 : f32
    %30 = vector.broadcast %cst_20 : f32 to vector<2x32xf32>
    %31 = arith.subf %30, %29 : vector<2x32xf32>
    %32 = math.exp %31 : vector<2x32xf32>
    %cst_21 = arith.constant 1.000000e+00 : f32
    %33 = vector.broadcast %cst_21 : f32 to vector<2x32xf32>
    %34 = arith.addf %33, %32 : vector<2x32xf32>
    %cst_22 = arith.constant 1.000000e+00 : f32
    %35 = vector.broadcast %cst_22 : f32 to vector<2x32xf32>
    %36 = arith.divf %35, %34 : vector<2x32xf32>
    %37 = vector.extract_strided_slice %20 {offsets = [0, 64], sizes = [2, 32], strides = [1, 1]} : vector<2x128xf32> to vector<2x32xf32>
    %38 = math.tanh %37 : vector<2x32xf32>
    %39 = vector.extract_strided_slice %20 {offsets = [0, 96], sizes = [2, 32], strides = [1, 1]} : vector<2x128xf32> to vector<2x32xf32>
    %cst_23 = arith.constant 0.000000e+00 : f32
    %40 = vector.broadcast %cst_23 : f32 to vector<2x32xf32>
    %41 = arith.subf %40, %39 : vector<2x32xf32>
    %42 = math.exp %41 : vector<2x32xf32>
    %cst_24 = arith.constant 1.000000e+00 : f32
    %43 = vector.broadcast %cst_24 : f32 to vector<2x32xf32>
    %44 = arith.addf %43, %42 : vector<2x32xf32>
    %cst_25 = arith.constant 1.000000e+00 : f32
    %45 = vector.broadcast %cst_25 : f32 to vector<2x32xf32>
    %46 = arith.divf %45, %44 : vector<2x32xf32>
    %c0_26 = arith.constant 0 : index
    %c0_27 = arith.constant 0 : index
    %47 = vector.load %arg22[%c0_26, %c0_27] : memref<2x32xf32, #tpu.memory_space<vmem>>, vector<2x32xf32>
    %48 = arith.mulf %36, %47 : vector<2x32xf32>
    %49 = arith.mulf %28, %38 : vector<2x32xf32>
    %50 = arith.addf %48, %49 : vector<2x32xf32>
    %51 = math.tanh %50 : vector<2x32xf32>
    %52 = arith.mulf %46, %51 : vector<2x32xf32>
    %c0_28 = arith.constant 0 : index
    %c0_29 = arith.constant 0 : index
    %53 = vector.load %arg22[%c0_28, %c0_29] : memref<2x32xf32, #tpu.memory_space<vmem>>, vector<2x32xf32>
    tpu.vector_store %arg22[%c0_28, %c0_29], %50 {strides = array<i32>} : memref<2x32xf32, #tpu.memory_space<vmem>>, vector<2x32xf32>,
    %c0_30 = arith.constant 0 : index
    %c0_31 = arith.constant 0 : index
    %54 = vector.load %arg21[%c0_30, %c0_31] : memref<2x32xf32, #tpu.memory_space<vmem>>, vector<2x32xf32>
    tpu.vector_store %arg21[%c0_30, %c0_31], %52 {strides = array<i32>} : memref<2x32xf32, #tpu.memory_space<vmem>>, vector<2x32xf32>,
    %c0_32 = arith.constant 0 : index
    %c0_33 = arith.constant 0 : index
    %55 = vector.load %arg11[%c0_32, %c0_33] : memref<32x32xbf16, #tpu.memory_space<vmem>>, vector<32x32xbf16>
    %56 = arith.truncf %52 : vector<2x32xf32> to vector<2x32xbf16>
    %cst_34 = arith.constant dense<0.000000e+00> : vector<2x32xf32>
    %57 = tpu.matmul %56, %55, %cst_34 {dimension_numbers = #tpu.dot_dimension_numbers<[1], [0], [0], [1], [0, 0, 1, 1], [], []>} : vector<2x32xbf16>, vector<32x32xbf16>, vector<2x32xf32> -> vector<2x32xf32>
    %c0_35 = arith.constant 0 : index
    %c0_36 = arith.constant 0 : index
    %58 = vector.load %arg12[%c0_35, %c0_36] : memref<1x32xf32, #tpu.memory_space<vmem>>, vector<1x32xf32>
    %59 = vector.broadcast %58 : vector<1x32xf32> to vector<2x32xf32>
    %60 = arith.addf %57, %59 : vector<2x32xf32>
    %61 = math.tanh %60 : vector<2x32xf32>
    %c0_37 = arith.constant 0 : index
    %c0_38 = arith.constant 0 : index
    %62 = vector.load %arg13[%c0_37, %c0_38] : memref<32x32xbf16, #tpu.memory_space<vmem>>, vector<32x32xbf16>
    %63 = arith.truncf %61 : vector<2x32xf32> to vector<2x32xbf16>
    %cst_39 = arith.constant dense<0.000000e+00> : vector<2x32xf32>
    %64 = tpu.matmul %63, %62, %cst_39 {dimension_numbers = #tpu.dot_dimension_numbers<[1], [0], [0], [1], [0, 0, 1, 1], [], []>} : vector<2x32xbf16>, vector<32x32xbf16>, vector<2x32xf32> -> vector<2x32xf32>
    %c0_40 = arith.constant 0 : index
    %c0_41 = arith.constant 0 : index
    %65 = vector.load %arg14[%c0_40, %c0_41] : memref<1x32xf32, #tpu.memory_space<vmem>>, vector<1x32xf32>
    %66 = vector.broadcast %65 : vector<1x32xf32> to vector<2x32xf32>
    %67 = arith.addf %64, %66 : vector<2x32xf32>
    %c0_42 = arith.constant 0 : index
    %c0_43 = arith.constant 0 : index
    %c0_44 = arith.constant 0 : index
    %68 = vector.load %arg25[%c0_42, %c0_43, %c0_44] : memref<2x16x32xf32, #tpu.memory_space<vmem>>, vector<2x16x32xf32>
    %69 = vector.shape_cast %67 : vector<2x32xf32> to vector<2x1x32xf32>
    %70 = vector.broadcast %69 : vector<2x1x32xf32> to vector<2x16x32xf32>
    %71 = arith.addf %68, %70 : vector<2x16x32xf32>
    %72 = math.tanh %71 : vector<2x16x32xf32>
    %c0_45 = arith.constant 0 : index
    %c0_46 = arith.constant 0 : index
    %73 = vector.load %arg15[%c0_45, %c0_46] : memref<1x32xf32, #tpu.memory_space<vmem>>, vector<1x32xf32>
    %74 = vector.shape_cast %73 : vector<1x32xf32> to vector<1x1x32xf32>
    %75 = vector.broadcast %74 : vector<1x1x32xf32> to vector<2x16x32xf32>
    %76 = arith.mulf %72, %75 : vector<2x16x32xf32>
    %cst_47 = arith.constant dense<0.000000e+00> : vector<2x16xf32>
    %77 = vector.multi_reduction <add>, %76, %cst_47 [2] : vector<2x16x32xf32> to vector<2x16xf32>
    %78 = vector.shape_cast %77 : vector<2x16xf32> to vector<2x16x1xf32>
    %79 = vector.shape_cast %78 : vector<2x16x1xf32> to vector<2x16x1xf32>
    %80 = vector.broadcast %79 : vector<2x16x1xf32> to vector<2x16x32xf32>
    %cst_48 = arith.constant dense<0xFF800000> : vector<2x32xf32>
    %81 = vector.multi_reduction <maximumf>, %80, %cst_48 [1] : vector<2x16x32xf32> to vector<2x32xf32>
    %82 = vector.shape_cast %81 : vector<2x32xf32> to vector<2x1x32xf32>
    %83 = vector.broadcast %82 : vector<2x1x32xf32> to vector<2x16x32xf32>
    %84 = arith.subf %80, %83 : vector<2x16x32xf32>
    %85 = math.exp %84 : vector<2x16x32xf32>
    %cst_49 = arith.constant dense<0.000000e+00> : vector<2x32xf32>
    %86 = vector.multi_reduction <add>, %85, %cst_49 [1] : vector<2x16x32xf32> to vector<2x32xf32>
    %87 = vector.shape_cast %86 : vector<2x32xf32> to vector<2x1x32xf32>
    %88 = vector.broadcast %87 : vector<2x1x32xf32> to vector<2x16x32xf32>
    %89 = arith.divf %85, %88 : vector<2x16x32xf32>
    %c0_50 = arith.constant 0 : index
    %c0_51 = arith.constant 0 : index
    %c0_52 = arith.constant 0 : index
    %90 = vector.load %arg24[%c0_50, %c0_51, %c0_52] : memref<2x16x32xf32, #tpu.memory_space<vmem>>, vector<2x16x32xf32>
    %91 = arith.mulf %89, %90 : vector<2x16x32xf32>
    %cst_53 = arith.constant dense<0.000000e+00> : vector<2x32xf32>
    %92 = vector.multi_reduction <add>, %91, %cst_53 [1] : vector<2x16x32xf32> to vector<2x32xf32>
    %93 = arith.addf %92, %61 : vector<2x32xf32>
    %c0_54 = arith.constant 0 : index
    %c0_55 = arith.constant 0 : index
    %94 = vector.load %arg16[%c0_54, %c0_55] : memref<32x32xbf16, #tpu.memory_space<vmem>>, vector<32x32xbf16>
    %95 = arith.truncf %93 : vector<2x32xf32> to vector<2x32xbf16>
    %cst_56 = arith.constant dense<0.000000e+00> : vector<2x32xf32>
    %96 = tpu.matmul %95, %94, %cst_56 {dimension_numbers = #tpu.dot_dimension_numbers<[1], [0], [0], [1], [0, 0, 1, 1], [], []>} : vector<2x32xbf16>, vector<32x32xbf16>, vector<2x32xf32> -> vector<2x32xf32>
    %c0_57 = arith.constant 0 : index
    %c0_58 = arith.constant 0 : index
    %97 = vector.load %arg17[%c0_57, %c0_58] : memref<1x32xf32, #tpu.memory_space<vmem>>, vector<1x32xf32>
    %98 = vector.broadcast %97 : vector<1x32xf32> to vector<2x32xf32>
    %99 = arith.addf %96, %98 : vector<2x32xf32>
    %100 = math.tanh %99 : vector<2x32xf32>
    %c0_59 = arith.constant 0 : index
    %c0_60 = arith.constant 0 : index
    %101 = vector.load %arg23[%c0_59, %c0_60] : memref<2x32xf32, #tpu.memory_space<vmem>>, vector<2x32xf32>
    tpu.vector_store %arg23[%c0_59, %c0_60], %100 {strides = array<i32>} : memref<2x32xf32, #tpu.memory_space<vmem>>, vector<2x32xf32>,
    %c0_61 = arith.constant 0 : index
    %c0_62 = arith.constant 0 : index
    %102 = vector.load %arg18[%c0_61, %c0_62] : memref<32x128xbf16, #tpu.memory_space<vmem>>, vector<32x128xbf16>
    %103 = arith.truncf %100 : vector<2x32xf32> to vector<2x32xbf16>
    %cst_63 = arith.constant dense<0.000000e+00> : vector<2x128xf32>
    %104 = tpu.matmul %103, %102, %cst_63 {dimension_numbers = #tpu.dot_dimension_numbers<[1], [0], [0], [1], [0, 0, 1, 1], [], []>} : vector<2x32xbf16>, vector<32x128xbf16>, vector<2x128xf32> -> vector<2x128xf32>
    %c0_64 = arith.constant 0 : index
    %c0_65 = arith.constant 0 : index
    %105 = vector.load %arg19[%c0_64, %c0_65] : memref<1x128xf32, #tpu.memory_space<vmem>>, vector<1x128xf32>
    %106 = vector.broadcast %105 : vector<1x128xf32> to vector<2x128xf32>
    %107 = arith.addf %104, %106 : vector<2x128xf32>
    %c0_66 = arith.constant 0 : index
    %c0_67 = arith.constant 0 : index
    %c0_68 = arith.constant 0 : index
    %108 = vector.load %arg20[%c0_66, %c0_67, %c0_68] : memref<1x2x128xf32, #tpu.memory_space<vmem>>, vector<1x2x128xf32>
    %109 = vector.shape_cast %108 : vector<1x2x128xf32> to vector<2x128xf32>
    %110 = vector.shape_cast %107 : vector<2x128xf32> to vector<1x2x128xf32>
    tpu.vector_store %arg20[%c0_66, %c0_67, %c0_68], %110 {strides = array<i32>} : memref<1x2x128xf32, #tpu.memory_space<vmem>>, vector<1x2x128xf32>,
    return
  }
  func.func @transform_0(%arg0: i32) -> (i32, i32, i32) {
    %c0_i32 = arith.constant 0 : i32
    %c0_i32_0 = arith.constant 0 : i32
    %c0_i32_1 = arith.constant 0 : i32
    return %arg0, %c0_i32, %c0_i32_0 : i32, i32, i32
  }
  func.func @transform_1(%arg0: i32) -> (i32, i32, i32) {
    %c0_i32 = arith.constant 0 : i32
    %c0_i32_0 = arith.constant 0 : i32
    %c0_i32_1 = arith.constant 0 : i32
    %c0_i32_2 = arith.constant 0 : i32
    return %c0_i32, %c0_i32_0, %c0_i32_1 : i32, i32, i32
  }
  func.func @transform_2(%arg0: i32) -> (i32, i32) {
    %c0_i32 = arith.constant 0 : i32
    %c0_i32_0 = arith.constant 0 : i32
    %c0_i32_1 = arith.constant 0 : i32
    return %c0_i32, %c0_i32_0 : i32, i32
  }
  func.func @transform_3(%arg0: i32) -> (i32, i32) {
    %c0_i32 = arith.constant 0 : i32
    %c0_i32_0 = arith.constant 0 : i32
    %c0_i32_1 = arith.constant 0 : i32
    return %c0_i32, %c0_i32_0 : i32, i32
  }
  func.func @transform_4(%arg0: i32) -> (i32, i32) {
    %c0_i32 = arith.constant 0 : i32
    %c0_i32_0 = arith.constant 0 : i32
    %c0_i32_1 = arith.constant 0 : i32
    return %c0_i32, %c0_i32_0 : i32, i32
  }
  func.func @transform_5(%arg0: i32) -> (i32, i32) {
    %c0_i32 = arith.constant 0 : i32
    %c0_i32_0 = arith.constant 0 : i32
    %c0_i32_1 = arith.constant 0 : i32
    return %c0_i32, %c0_i32_0 : i32, i32
  }
  func.func @transform_6(%arg0: i32) -> (i32, i32) {
    %c0_i32 = arith.constant 0 : i32
    %c0_i32_0 = arith.constant 0 : i32
    %c0_i32_1 = arith.constant 0 : i32
    return %c0_i32, %c0_i32_0 : i32, i32
  }
  func.func @transform_7(%arg0: i32) -> (i32, i32) {
    %c0_i32 = arith.constant 0 : i32
    %c0_i32_0 = arith.constant 0 : i32
    %c0_i32_1 = arith.constant 0 : i32
    return %c0_i32, %c0_i32_0 : i32, i32
  }
  func.func @transform_8(%arg0: i32) -> (i32, i32) {
    %c0_i32 = arith.constant 0 : i32
    %c0_i32_0 = arith.constant 0 : i32
    %c0_i32_1 = arith.constant 0 : i32
    return %c0_i32, %c0_i32_0 : i32, i32
  }
  func.func @transform_9(%arg0: i32) -> (i32, i32) {
    %c0_i32 = arith.constant 0 : i32
    %c0_i32_0 = arith.constant 0 : i32
    %c0_i32_1 = arith.constant 0 : i32
    return %c0_i32, %c0_i32_0 : i32, i32
  }
  func.func @transform_10(%arg0: i32) -> (i32, i32) {
    %c0_i32 = arith.constant 0 : i32
    %c0_i32_0 = arith.constant 0 : i32
    %c0_i32_1 = arith.constant 0 : i32
    return %c0_i32, %c0_i32_0 : i32, i32
  }
  func.func @transform_11(%arg0: i32) -> (i32, i32) {
    %c0_i32 = arith.constant 0 : i32
    %c0_i32_0 = arith.constant 0 : i32
    %c0_i32_1 = arith.constant 0 : i32
    return %c0_i32, %c0_i32_0 : i32, i32
  }
  func.func @transform_12(%arg0: i32) -> (i32, i32) {
    %c0_i32 = arith.constant 0 : i32
    %c0_i32_0 = arith.constant 0 : i32
    %c0_i32_1 = arith.constant 0 : i32
    return %c0_i32, %c0_i32_0 : i32, i32
  }
  func.func @transform_13(%arg0: i32) -> (i32, i32) {
    %c0_i32 = arith.constant 0 : i32
    %c0_i32_0 = arith.constant 0 : i32
    %c0_i32_1 = arith.constant 0 : i32
    return %c0_i32, %c0_i32_0 : i32, i32
  }
  func.func @transform_14(%arg0: i32) -> (i32, i32) {
    %c0_i32 = arith.constant 0 : i32
    %c0_i32_0 = arith.constant 0 : i32
    %c0_i32_1 = arith.constant 0 : i32
    return %c0_i32, %c0_i32_0 : i32, i32
  }
  func.func @transform_15(%arg0: i32) -> (i32, i32) {
    %c0_i32 = arith.constant 0 : i32
    %c0_i32_0 = arith.constant 0 : i32
    %c0_i32_1 = arith.constant 0 : i32
    return %c0_i32, %c0_i32_0 : i32, i32
  }
  func.func @transform_16(%arg0: i32) -> (i32, i32) {
    %c0_i32 = arith.constant 0 : i32
    %c0_i32_0 = arith.constant 0 : i32
    %c0_i32_1 = arith.constant 0 : i32
    return %c0_i32, %c0_i32_0 : i32, i32
  }
  func.func @transform_17(%arg0: i32) -> (i32, i32) {
    %c0_i32 = arith.constant 0 : i32
    %c0_i32_0 = arith.constant 0 : i32
    %c0_i32_1 = arith.constant 0 : i32
    return %c0_i32, %c0_i32_0 : i32, i32
  }
  func.func @transform_18(%arg0: i32) -> (i32, i32) {
    %c0_i32 = arith.constant 0 : i32
    %c0_i32_0 = arith.constant 0 : i32
    %c0_i32_1 = arith.constant 0 : i32
    return %c0_i32, %c0_i32_0 : i32, i32
  }
  func.func @transform_19(%arg0: i32) -> (i32, i32, i32) {
    %c0_i32 = arith.constant 0 : i32
    %c0_i32_0 = arith.constant 0 : i32
    %c0_i32_1 = arith.constant 0 : i32
    return %arg0, %c0_i32, %c0_i32_0 : i32, i32, i32
  }
}

</mosaic_0001>

<bundles_post_ra>
// kernel: tpu_custom_call.1
= control target key start
LH: loop header
LB: loop body
LE: loop exit
PB: predicated region body
PF: predicated region fallthrough
CT: control target
= control target key end

     0   :  { %s3493_s0 = inlined_call_operand.hbm [shape: f32[6,2,32], index: 0, kind: input, shape index: {}]   ;;  %s3494_s1 = inlined_call_operand.hbm [shape: f32[2,16,32], index: 1, kind: input, shape index: {}]   ;;  %s3495_s2 = inlined_call_operand.hbm [shape: bf16[32,128], index: 2, kind: input, shape index: {}]   ;;  %s3496_s3 = inlined_call_operand.hbm [shape: bf16[32,128], index: 3, kind: input, shape index: {}]   ;;  %s3497_s4 = inlined_call_operand.hbm [shape: bf16[32,128], index: 4, kind: input, shape index: {}]   ;;  %s3498_s5 = inlined_call_operand.hbm [shape: f32[1,128], index: 5, kind: input, shape index: {}]   ;;  %s3499_s6 = inlined_call_operand.vmem [shape: bf16[32,32], index: 6, kind: input, shape index: {}]   ;;  %s3500_s7 = inlined_call_operand.hbm [shape: f32[1,32], index: 7, kind: input, shape index: {}]   ;;  %s3501_s8 = inlined_call_operand.hbm [shape: bf16[32,32], index: 8, kind: input, shape index: {}]   ;;  %s3502_s9 = inlined_call_operand.hbm [shape: f32[1,32], index: 9, kind: input, shape index: {}]   ;;  %s3503_s10 = inlined_call_operand.vmem [shape: bf16[32,32], index: 10, kind: input, shape index: {}]   ;;  %s3504_s11 = inlined_call_operand.hbm [shape: f32[1,32], index: 11, kind: input, shape index: {}]   ;;  %s3505_s12 = inlined_call_operand.hbm [shape: bf16[32,32], index: 12, kind: input, shape index: {}]   ;;  %s3506_s13 = inlined_call_operand.hbm [shape: f32[1,32], index: 13, kind: input, shape index: {}]   ;;  %s3507_s14 = inlined_call_operand.hbm [shape: f32[1,32], index: 14, kind: input, shape index: {}]   ;;  %s3508_s15 = inlined_call_operand.vmem [shape: bf16[32,32], index: 15, kind: input, shape index: {}]   ;;  %s3509_s16 = inlined_call_operand.hbm [shape: f32[1,32], index: 16, kind: input, shape index: {}]   ;;  %s3510_s17 = inlined_call_operand.vmem [shape: bf16[32,128], index: 17, kind: input, shape index: {}]   ;;  %s3511_s18 = inlined_call_operand.vmem [shape: f32[1,128], index: 18, kind: input, shape index: {}]   ;;  %s3512_s19 = inlined_call_operand.hbm [shape: f32[6,2,128], index: 19, kind: output, shape index: {}]  }
   0x1   :  { %3537 = sst [smem:[#allocation43_spill]] %s3493_s0 }
   0x2   :  { %3538 = sst [smem:[#allocation44_spill]] %s3494_s1 }
   0x3   :  { %3539 = sst [smem:[#allocation45_spill]] %s3495_s2 }
   0x4   :  { %3540 = sst [smem:[#allocation46_spill]] %s3496_s3 }
   0x5   :  { %3541 = sst [smem:[#allocation47_spill]] %s3497_s4 }
   0x6   :  { %3542 = sst [smem:[#allocation48_spill]] %s3498_s5 }
   0x7   :  { %3543 = sst [smem:[#allocation49_spill]] %s3499_s6 }
   0x8   :  { %3544 = sst [smem:[#allocation50_spill]] %s3503_s10 }
   0x9   :  { %3545 = sst [smem:[#allocation51_spill]] %s3508_s15 }
   0xa   :  { %3546 = sst [smem:[#allocation52_spill]] %s3510_s17 }
   0xb   :  { %3547 = sst [smem:[#allocation53_spill]] %s3511_s18 }
   0xc   :  { %3548 = sst [smem:[#allocation54_spill]] %s3512_s19 }
   0xd   :  { %24 = vsyncpa [#allocation8], 0 }
   0xe   :  { %26 = vsyncpa [#allocation8 + $0x1], 0 }
   0xf   :  { %27 = vsyncpa [#allocation11], 0 }
  0x10   :  { %28 = vsyncpa [#allocation14], 0 }
  0x11   :  { %29 = vsyncpa [#allocation17], 0 }
  0x12   :  { %30 = vsyncpa [#allocation20], 0 }
  0x13   :  { %31 = vsyncpa [#allocation23], 0 }
  0x14   :  { %32 = vsyncpa [#allocation26], 0 }
  0x15   :  { %33 = vsyncpa [#allocation29], 0 }
  0x16   :  { %34 = vsyncpa [#allocation9], 0 }
  0x17   :  { %36 = vsyncpa [#allocation9 + $0x1], 0  ;;  %s2907_s0 = smov 0   ;;  %s2909_s30 = smov 0  }
  0x18   :  { %s2911_s20 = smov 0   ;;  %s2913_s21 = smov 0  }
  0x19 LB: > { %3549 = sst [smem:[#allocation40_spill]] %s2767_s0  ;;  %s2781_s1 = smov [#allocation10]   ;;  %s2779_s21 = sphi %s2913_s21, %s3602_s21   ;;  %s2775_s20 = sphi %s2911_s20, %s3601_s20   ;;  %s2771_s30 = sphi %s2909_s30, %s3600_s30   ;;  %s2767_s0 = sphi %s2907_s0, %s3599_s0  }
  0x1a   : > { %s489_s22 = sshll.u32 %s2781_s1, 4  ;;  %s2928_s2 = sadd.s32 4294967295, %s2779_s21   ;;  %s2934_s22 = int_to_ptr.vmem [resolvable:$true] %s489_s22 }
  0x1b   : > { %3550 = sst [smem:[#allocation41_spill]] %s2928_s2  ;;  %p1877_p0 = scmp.ge.s32.totalorder %s2779_s21, 1 }
  0x1c   : > { %p3526_p1 = scmp.eq.s32.totalorder %s2928_s2, 0  ;;  %p477_p2 = scmp.lt.s32.totalorder %s2779_s21, 7 }
  0x1d   : > { %s2782_s25 = smov [#allocation13]   ;;  %s2783_s26 = smov [#allocation16]  }
  0x1e   : > { %p2936_p4 = pnand %p1877_p0, %p477_p2  ;;  %s515_s3 = sshll.u32 %s2782_s25, 4  ;;  %s2948_s3 = int_to_ptr.vmem [resolvable:$true] %s515_s3 }
  0x1f   : > { %s2950_s27 = sshll.u32 %s2783_s26, 4  ;;  %s3554_s1 = sld [smem:[#allocation44_spill]]  ;;  %s543_s27 = int_to_ptr.vmem [resolvable:$true] %s2950_s27 }
  0x20   : > { %s3551_s23 = scalar_select %p2936_p4, 1, 0 }
  0x21   : > { %p2109_p5 = pneg %p2936_p4 }
  0x22   : > { %3552 = sst [smem:[#allocation42_spill]] %s3551_s23 }
  0x23   : > { %p2944_p6 = pnand %p2109_p5, %p3526_p1 }
  0x25   : > { %s2291_s19 = scalar_lea.hbm %s3554_s1, 512  ;;  %p2960_p8 = pneg %p2944_p6 }
  0x26   : > { %p2292_p7 = scmp.ne.s32.totalorder %s3554_s1, %s2291_s19  ;;  %p2298_p11 = scmp.lt.u32.totalorder %s2291_s19, %s3554_s1 }
  0x28   : > { %p2294_p9 = pnand %p2960_p8, %p2292_p7 }
  0x2a   : > { %p2295_p10 = pneg %p2294_p9 }
  0x2c   : > { %p2300_p12 = pnand %p2298_p11, %p2295_p10 }
  0x2e   : > { %2303 = shalt.err (!%p2300_p12)
}
  0x2f   : > { %s2304_s17 = scalar_lea.vmem %s2934_s22, 512  ;;  %p2312_p5 = scmp.lt.s32.totalorder %s2934_s22, %s2934_s22 }
  0x30   : > { %p2305_p13 = scmp.ne.s32.totalorder %s2934_s22, %s2304_s17  ;;  %p2313_p3 = scmp.lt.s32.totalorder %s2304_s17, %s2304_s17 }
  0x32   : > { %p2307_p0 = pnand %p2305_p13, %p2960_p8  ;;  %p2314_p7 = por %p2313_p3, %p2312_p5 }
  0x34   : > { %p2308_p2 = pneg %p2307_p0 }
  0x36   : > { %p2315_p9 = pnand %p2314_p7, %p2308_p2 }
  0x38   : > { %2318 = shalt.err (!%p2315_p9)
}
  0x39   : > { %s2784_s18 = smov 128   ;;  %s2785_s19 = smov 8  }
  0x3a   : > { %2112 = dma.hbm_to_vmem [thread:$0]  (!%p2944_p6), %s3554_s1, 512, %s2934_s22, [#allocation11], %s2784_s18, %s2784_s18, %s2785_s19  }
  0x3b   : > { %s3556_s10 = sld [smem:[#allocation46_spill]] }
  0x41   : > { %s2319_s6 = scalar_lea.hbm %s3556_s10, 256 }
  0x42   : > { %p2320_p3 = scmp.ne.s32.totalorder %s3556_s10, %s2319_s6  ;;  %p2326_p12 = scmp.lt.u32.totalorder %s2319_s6, %s3556_s10 }
  0x44   : > { %p2322_p10 = pnand %p2320_p3, %p2960_p8 }
  0x46   : > { %p2323_p11 = pneg %p2322_p10 }
  0x48   : > { %p2328_p13 = pnand %p2326_p12, %p2323_p11 }
  0x4a   : > { %2331 = shalt.err (!%p2328_p13)
}
  0x4b   : > { %s2332_s22 = scalar_lea.vmem %s2948_s3, 256  ;;  %p2340_p7 = scmp.lt.s32.totalorder %s2948_s3, %s2948_s3 }
  0x4c   : > { %p2333_p0 = scmp.ne.s32.totalorder %s2948_s3, %s2332_s22  ;;  %p2341_p9 = scmp.lt.s32.totalorder %s2332_s22, %s2332_s22 }
  0x4e   : > { %p2335_p2 = pnand %p2333_p0, %p2960_p8  ;;  %p2342_p3 = por %p2341_p9, %p2340_p7 }
  0x50   : > { %p2336_p5 = pneg %p2335_p2 }
  0x52   : > { %p2343_p10 = pnand %p2342_p3, %p2336_p5 }
  0x54   : > { %2346 = shalt.err (!%p2343_p10)
}
  0x55   : > { %s3528_s2 = smov 64   ;;  %s3530_s6 = smov 4  }
  0x56   : > { %2118 = dma.hbm_to_vmem [thread:$0]  (!%p2944_p6), %s3556_s10, 256, %s2948_s3, [#allocation14], %s3528_s2, %s3528_s2, %s3530_s6  }
  0x57   : > { %s3557_s5 = sld [smem:[#allocation48_spill]] }
  0x5d   : > { %s2347_s28 = scalar_lea.hbm %s3557_s5, 16 }
  0x5e   : > { %p2348_p11 = scmp.ne.s32.totalorder %s3557_s5, %s2347_s28  ;;  %p2354_p0 = scmp.lt.u32.totalorder %s2347_s28, %s3557_s5 }
  0x60   : > { %p2350_p12 = pnand %p2348_p11, %p2960_p8 }
  0x62   : > { %p2351_p13 = pneg %p2350_p12 }
  0x64   : > { %p2356_p2 = pnand %p2354_p0, %p2351_p13 }
  0x66   : > { %2359 = shalt.err (!%p2356_p2)
}
  0x67   : > { %s2360_s22 = scalar_lea.vmem %s543_s27, 16  ;;  %s2367_s3 = scalar_lea.vmem %s543_s27, 32 }
  0x68   : > { %p2361_p5 = scmp.ne.s32.totalorder %s543_s27, %s2360_s22  ;;  %p2368_p3 = scmp.lt.s32.totalorder %s543_s27, %s543_s27 }
  0x69   : > { %p2369_p10 = scmp.lt.s32.totalorder %s2367_s3, %s2360_s22 }
  0x6a   : > { %p2363_p7 = pnand %p2361_p5, %p2960_p8 }
  0x6b   : > { %p2370_p1 = por %p2369_p10, %p2368_p3 }
  0x6c   : > { %p2364_p9 = pneg %p2363_p7 }
  0x6e   : > { %p2371_p4 = pnand %p2370_p1, %p2364_p9 }
  0x70   : > { %2374 = shalt.err (!%p2371_p4)
}
  0x71   : > { %2124 = dma.hbm_to_vmem [thread:$0]  (!%p2944_p6), %s3557_s5, 16, %s543_s27, [#allocation17]  }
  0x72   : > { %s2788_s18 = smov [#allocation19]   ;;  %s2789_s28 = smov [#allocation22]  }
  0x73   : > { %s566_s19 = sshll.u32 %s2788_s18, 4  ;;  %s594_s29 = sshll.u32 %s2789_s28, 4  ;;  %s567_s19 = int_to_ptr.vmem [resolvable:$true] %s566_s19  ;;  %s595_s29 = int_to_ptr.vmem [resolvable:$true] %s594_s29 }
  0x74   : > { %s2375_s17 = scalar_lea.hbm %s3501_s8, 256 }
  0x75   : > { %p2376_p1 = scmp.ne.s32.totalorder %s3501_s8, %s2375_s17  ;;  %p2382_p12 = scmp.lt.u32.totalorder %s2375_s17, %s3501_s8 }
  0x77   : > { %p2378_p4 = pnand %p2376_p1, %p2960_p8 }
  0x79   : > { %p2379_p11 = pneg %p2378_p4 }
  0x7b   : > { %p2384_p13 = pnand %p2382_p12, %p2379_p11 }
  0x7d   : > { %2387 = shalt.err (!%p2384_p13)
}
  0x7e   : > { %s2388_s27 = scalar_lea.vmem %s567_s19, 256  ;;  %p2396_p7 = scmp.lt.s32.totalorder %s567_s19, %s567_s19 }
  0x7f   : > { %p2389_p0 = scmp.ne.s32.totalorder %s567_s19, %s2388_s27  ;;  %p2397_p9 = scmp.lt.s32.totalorder %s2388_s27, %s2388_s27 }
  0x81   : > { %p2391_p2 = pnand %p2389_p0, %p2960_p8  ;;  %p2398_p3 = por %p2397_p9, %p2396_p7 }
  0x83   : > { %p2392_p5 = pneg %p2391_p2 }
  0x85   : > { %p2399_p10 = pnand %p2398_p3, %p2392_p5 }
  0x87   : > { %2402 = shalt.err (!%p2399_p10)
}
  0x88   : > { %s3558_s23 = smov 64   ;;  %s2403_s26 = scalar_lea.hbm %s3504_s11, 16 }
  0x89   : > { %2130 = dma.hbm_to_vmem [thread:$0]  (!%p2944_p6), %s3501_s8, 256, %s567_s19, [#allocation20], %s3558_s23, %s3558_s23, %s3530_s6  }
  0x8a   : > { %p2404_p1 = scmp.ne.s32.totalorder %s3504_s11, %s2403_s26  ;;  %p2410_p12 = scmp.lt.u32.totalorder %s2403_s26, %s3504_s11 }
  0x8c   : > { %p2406_p4 = pnand %p2404_p1, %p2960_p8 }
  0x8e   : > { %p2407_p11 = pneg %p2406_p4 }
  0x90   : > { %p2412_p13 = pnand %p2410_p12, %p2407_p11 }
  0x92   : > { %2415 = shalt.err (!%p2412_p13)
}
  0x93   : > { %s2416_s27 = scalar_lea.vmem %s595_s29, 16  ;;  %s2423_s19 = scalar_lea.vmem %s595_s29, 32 }
  0x94   : > { %p2417_p0 = scmp.ne.s32.totalorder %s595_s29, %s2416_s27  ;;  %p2424_p7 = scmp.lt.s32.totalorder %s595_s29, %s595_s29 }
  0x95   : > { %p2425_p9 = scmp.lt.s32.totalorder %s2423_s19, %s2416_s27 }
  0x96   : > { %p2419_p2 = pnand %p2417_p0, %p2960_p8 }
  0x97   : > { %p2426_p3 = por %p2425_p9, %p2424_p7 }
  0x98   : > { %p2420_p5 = pneg %p2419_p2 }
  0x9a   : > { %p2427_p10 = pnand %p2426_p3, %p2420_p5 }
  0x9c   : > { %2430 = shalt.err (!%p2427_p10)
}
  0x9d   : > { %2136 = dma.hbm_to_vmem [thread:$0]  (!%p2944_p6), %s3504_s11, 16, %s595_s29, [#allocation23]  }
  0x9e   : > { %s2790_s28 = smov [#allocation25]   ;;  %s2791_s26 = smov [#allocation12]  }
  0x9f   : > { %s618_s25 = sshll.u32 %s2790_s28, 4  ;;  %s502_s17 = sshll.u32 %s2791_s26, 4  ;;  %s619_s25 = int_to_ptr.vmem [resolvable:$true] %s618_s25  ;;  %s503_s17 = int_to_ptr.vmem [resolvable:$true] %s502_s17 }
  0xa0   : > { %s2431_s0 = scalar_lea.hbm %s3506_s13, 16 }
  0xa1   : > { %p2432_p1 = scmp.ne.s32.totalorder %s3506_s13, %s2431_s0  ;;  %p2438_p12 = scmp.lt.u32.totalorder %s2431_s0, %s3506_s13 }
  0xa3   : > { %p2434_p4 = pnand %p2432_p1, %p2960_p8 }
  0xa5   : > { %p2435_p11 = pneg %p2434_p4 }
  0xa7   : > { %p2440_p13 = pnand %p2438_p12, %p2435_p11 }
  0xa9   : > { %2443 = shalt.err (!%p2440_p13)
}
  0xaa   : > { %s2444_s29 = scalar_lea.vmem %s619_s25, 16  ;;  %s2451_s18 = scalar_lea.vmem %s619_s25, 32 }
  0xab   : > { %p2445_p0 = scmp.ne.s32.totalorder %s619_s25, %s2444_s29  ;;  %p2452_p7 = scmp.lt.s32.totalorder %s619_s25, %s619_s25 }
  0xac   : > { %p2453_p9 = scmp.lt.s32.totalorder %s2451_s18, %s2444_s29 }
  0xad   : > { %p2447_p2 = pnand %p2445_p0, %p2960_p8 }
  0xae   : > { %p2454_p3 = por %p2453_p9, %p2452_p7 }
  0xaf   : > { %p2448_p5 = pneg %p2447_p2 }
  0xb1   : > { %p2455_p10 = pnand %p2454_p3, %p2448_p5 }
  0xb3   : > { %2458 = shalt.err (!%p2455_p10)
}
  0xb4   : > { %2142 = dma.hbm_to_vmem [thread:$0]  (!%p2944_p6), %s3506_s13, 16, %s619_s25, [#allocation26]  }
  0xb5   : > { %s3559_s3 = sld [smem:[#allocation45_spill]] }
  0xbb   : > { %s2459_s0 = scalar_lea.hbm %s3559_s3, 256 }
  0xbc   : > { %p2460_p1 = scmp.ne.s32.totalorder %s3559_s3, %s2459_s0  ;;  %p2466_p12 = scmp.lt.u32.totalorder %s2459_s0, %s3559_s3 }
  0xbe   : > { %p2462_p4 = pnand %p2460_p1, %p2960_p8 }
  0xc0   : > { %p2463_p11 = pneg %p2462_p4 }
  0xc2   : > { %p2468_p13 = pnand %p2466_p12, %p2463_p11 }
  0xc4   : > { %2471 = shalt.err (!%p2468_p13)
}
  0xc5   : > { %s2472_s18 = scalar_lea.vmem %s503_s17, 256  ;;  %p2480_p7 = scmp.lt.s32.totalorder %s503_s17, %s503_s17 }
  0xc6   : > { %p2473_p0 = scmp.ne.s32.totalorder %s503_s17, %s2472_s18  ;;  %p2481_p9 = scmp.lt.s32.totalorder %s2472_s18, %s2472_s18 }
  0xc8   : > { %p2475_p2 = pnand %p2473_p0, %p2960_p8  ;;  %p2482_p3 = por %p2481_p9, %p2480_p7 }
  0xca   : > { %p2476_p5 = pneg %p2475_p2 }
  0xcc   : > { %p2483_p10 = pnand %p2482_p3, %p2476_p5 }
  0xce   : > { %2486 = shalt.err (!%p2483_p10)
}
  0xcf   : > { %s3560_s25 = smov 4   ;;  %s2792_s6 = smov [#allocation15]  }
  0xd0   : > { %2115 = dma.hbm_to_vmem [thread:$0]  (!%p2944_p6), %s3559_s3, 256, %s503_s17, [#allocation11], %s3558_s23, %s3558_s23, %s3560_s25  }
  0xd1   : > { %s528_s22 = sshll.u32 %s2792_s6, 4  ;;  %s2793_s0 = smov [#allocation18]   ;;  %s529_s22 = int_to_ptr.vmem [resolvable:$true] %s528_s22 }
  0xd2   : > { %s556_s27 = sshll.u32 %s2793_s0, 4  ;;  %s3561_s4 = sld [smem:[#allocation47_spill]]  ;;  %s557_s27 = int_to_ptr.vmem [resolvable:$true] %s556_s27 }
  0xd8   : > { %s2487_s29 = scalar_lea.hbm %s3561_s4, 256 }
  0xd9   : > { %p2488_p1 = scmp.ne.s32.totalorder %s3561_s4, %s2487_s29  ;;  %p2494_p12 = scmp.lt.u32.totalorder %s2487_s29, %s3561_s4 }
  0xdb   : > { %p2490_p4 = pnand %p2488_p1, %p2960_p8 }
  0xdd   : > { %p2491_p11 = pneg %p2490_p4 }
  0xdf   : > { %p2496_p13 = pnand %p2494_p12, %p2491_p11 }
  0xe1   : > { %2499 = shalt.err (!%p2496_p13)
}
  0xe2   : > { %s2500_s17 = scalar_lea.vmem %s529_s22, 256  ;;  %p2508_p7 = scmp.lt.s32.totalorder %s529_s22, %s529_s22 }
  0xe3   : > { %p2501_p0 = scmp.ne.s32.totalorder %s529_s22, %s2500_s17  ;;  %p2509_p9 = scmp.lt.s32.totalorder %s2500_s17, %s2500_s17 }
  0xe5   : > { %p2503_p2 = pnand %p2501_p0, %p2960_p8  ;;  %p2510_p3 = por %p2509_p9, %p2508_p7 }
  0xe7   : > { %p2504_p5 = pneg %p2503_p2 }
  0xe9   : > { %p2511_p10 = pnand %p2510_p3, %p2504_p5 }
  0xeb   : > { %2514 = shalt.err (!%p2511_p10)
}
  0xec   : > { %2121 = dma.hbm_to_vmem [thread:$0]  (!%p2944_p6), %s3561_s4, 256, %s529_s22, [#allocation14], %s3558_s23, %s3558_s23, %s3560_s25  }
  0xed   : > { %s2515_s0 = scalar_lea.hbm %s3500_s7, 16 }
  0xee   : > { %p2516_p1 = scmp.ne.s32.totalorder %s3500_s7, %s2515_s0  ;;  %p2522_p12 = scmp.lt.u32.totalorder %s2515_s0, %s3500_s7 }
  0xf0   : > { %p2518_p4 = pnand %p2516_p1, %p2960_p8 }
  0xf2   : > { %p2519_p11 = pneg %p2518_p4 }
  0xf4   : > { %p2524_p13 = pnand %p2522_p12, %p2519_p11 }
  0xf6   : > { %2527 = shalt.err (!%p2524_p13)
}
  0xf7   : > { %s2528_s28 = scalar_lea.vmem %s557_s27, 16  ;;  %s2535_s22 = scalar_lea.vmem %s557_s27, 32 }
  0xf8   : > { %p2529_p0 = scmp.ne.s32.totalorder %s557_s27, %s2528_s28  ;;  %p2536_p7 = scmp.lt.s32.totalorder %s557_s27, %s557_s27 }
  0xf9   : > { %p2537_p9 = scmp.lt.s32.totalorder %s2535_s22, %s2528_s28 }
  0xfa   : > { %p2531_p2 = pnand %p2529_p0, %p2960_p8 }
  0xfb   : > { %p2538_p3 = por %p2537_p9, %p2536_p7 }
  0xfc   : > { %p2532_p5 = pneg %p2531_p2 }
  0xfe   : > { %p2539_p10 = pnand %p2538_p3, %p2532_p5 }
 0x100   : > { %2542 = shalt.err (!%p2539_p10)
}
 0x101   : > { %2127 = dma.hbm_to_vmem [thread:$0]  (!%p2944_p6), %s3500_s7, 16, %s557_s27, [#allocation17]  }
 0x102   : > { %s2794_s1 = smov [#allocation21]   ;;  %s2795_s6 = smov [#allocation24]  }
 0x103   : > { %s580_s26 = sshll.u32 %s2794_s1, 4  ;;  %s604_s0 = sshll.u32 %s2795_s6, 4  ;;  %s581_s26 = int_to_ptr.vmem [resolvable:$true] %s580_s26  ;;  %s605_s0 = int_to_ptr.vmem [resolvable:$true] %s604_s0 }
 0x104   : > { %s2543_s29 = scalar_lea.hbm %s3502_s9, 16 }
 0x105   : > { %p2544_p1 = scmp.ne.s32.totalorder %s3502_s9, %s2543_s29  ;;  %p2550_p12 = scmp.lt.u32.totalorder %s2543_s29, %s3502_s9 }
 0x107   : > { %p2546_p4 = pnand %p2544_p1, %p2960_p8 }
 0x109   : > { %p2547_p11 = pneg %p2546_p4 }
 0x10b   : > { %p2552_p13 = pnand %p2550_p12, %p2547_p11 }
 0x10d   : > { %2555 = shalt.err (!%p2552_p13)
}
 0x10e   : > { %s2556_s27 = scalar_lea.vmem %s581_s26, 16  ;;  %s2563_s5 = scalar_lea.vmem %s581_s26, 32 }
 0x10f   : > { %p2557_p0 = scmp.ne.s32.totalorder %s581_s26, %s2556_s27  ;;  %p2564_p7 = scmp.lt.s32.totalorder %s581_s26, %s581_s26 }
 0x110   : > { %p2565_p9 = scmp.lt.s32.totalorder %s2563_s5, %s2556_s27 }
 0x111   : > { %p2559_p2 = pnand %p2557_p0, %p2960_p8 }
 0x112   : > { %p2566_p3 = por %p2565_p9, %p2564_p7 }
 0x113   : > { %p2560_p5 = pneg %p2559_p2 }
 0x115   : > { %p2567_p10 = pnand %p2566_p3, %p2560_p5 }
 0x117   : > { %2570 = shalt.err (!%p2567_p10)
}
 0x118   : > { %2133 = dma.hbm_to_vmem [thread:$0]  (!%p2944_p6), %s3502_s9, 16, %s581_s26, [#allocation20]  }
 0x119   : > { %s2571_s29 = scalar_lea.hbm %s3505_s12, 256 }
 0x11a   : > { %p2572_p1 = scmp.ne.s32.totalorder %s3505_s12, %s2571_s29  ;;  %p2578_p12 = scmp.lt.u32.totalorder %s2571_s29, %s3505_s12 }
 0x11c   : > { %p2574_p4 = pnand %p2572_p1, %p2960_p8 }
 0x11e   : > { %p2575_p11 = pneg %p2574_p4 }
 0x120   : > { %p2580_p13 = pnand %p2578_p12, %p2575_p11 }
 0x122   : > { %2583 = shalt.err (!%p2580_p13)
}
 0x123   : > { %s2584_s27 = scalar_lea.vmem %s605_s0, 256  ;;  %p2592_p7 = scmp.lt.s32.totalorder %s605_s0, %s605_s0 }
 0x124   : > { %p2585_p0 = scmp.ne.s32.totalorder %s605_s0, %s2584_s27  ;;  %p2593_p9 = scmp.lt.s32.totalorder %s2584_s27, %s2584_s27 }
 0x126   : > { %p2587_p2 = pnand %p2585_p0, %p2960_p8  ;;  %p2594_p3 = por %p2593_p9, %p2592_p7 }
 0x128   : > { %p2588_p5 = pneg %p2587_p2 }
 0x12a   : > { %p2595_p10 = pnand %p2594_p3, %p2588_p5 }
 0x12c   : > { %2598 = shalt.err (!%p2595_p10)
}
 0x12d   : > { %2139 = dma.hbm_to_vmem [thread:$0]  (!%p2944_p6), %s3505_s12, 256, %s605_s0, [#allocation23], %s3558_s23, %s3558_s23, %s3560_s25  }
 0x12e   : > { %s2796_s1 = smov [#allocation27]   ;;  %s2797_s19 = smov [#allocation28]  }
 0x12f   : > { %s629_s6 = sshll.u32 %s2796_s1, 4  ;;  %s643_s2 = sshll.u32 %s2797_s19, 4  ;;  %s630_s6 = int_to_ptr.vmem [resolvable:$true] %s629_s6  ;;  %s644_s2 = int_to_ptr.vmem [resolvable:$true] %s643_s2 }
 0x130   : > { %s2599_s28 = scalar_lea.hbm %s3507_s14, 16 }
 0x131   : > { %p2600_p1 = scmp.ne.s32.totalorder %s3507_s14, %s2599_s28  ;;  %p2606_p12 = scmp.lt.u32.totalorder %s2599_s28, %s3507_s14 }
 0x133   : > { %p2602_p4 = pnand %p2600_p1, %p2960_p8 }
 0x135   : > { %p2603_p11 = pneg %p2602_p4 }
 0x137   : > { %p2608_p13 = pnand %p2606_p12, %p2603_p11 }
 0x139   : > { %2611 = shalt.err (!%p2608_p13)
}
 0x13a   : > { %s2612_s23 = scalar_lea.vmem %s630_s6, 16  ;;  %s2619_s25 = scalar_lea.vmem %s630_s6, 32 }
 0x13b   : > { %p2613_p0 = scmp.ne.s32.totalorder %s630_s6, %s2612_s23  ;;  %p2620_p7 = scmp.lt.s32.totalorder %s630_s6, %s630_s6 }
 0x13c   : > { %p2621_p9 = scmp.lt.s32.totalorder %s2619_s25, %s2612_s23 }
 0x13d   : > { %p2615_p2 = pnand %p2613_p0, %p2960_p8 }
 0x13e   : > { %p2622_p3 = por %p2621_p9, %p2620_p7 }
 0x13f   : > { %p2616_p5 = pneg %p2615_p2 }
 0x141   : > { %p2623_p10 = pnand %p2622_p3, %p2616_p5 }
 0x143   : > { %2626 = shalt.err (!%p2623_p10)
}
 0x144   : > { %2145 = dma.hbm_to_vmem [thread:$0]  (!%p2944_p6), %s3507_s14, 16, %s630_s6, [#allocation26]  }
 0x145   : > { %s2627_s29 = scalar_lea.hbm %s3509_s16, 16 }
 0x146   : > { %p2628_p1 = scmp.ne.s32.totalorder %s3509_s16, %s2627_s29  ;;  %p2634_p12 = scmp.lt.u32.totalorder %s2627_s29, %s3509_s16 }
 0x148   : > { %p2630_p4 = pnand %p2628_p1, %p2960_p8 }
 0x14a   : > { %p2631_p11 = pneg %p2630_p4 }
 0x14c   : > { %p2636_p13 = pnand %p2634_p12, %p2631_p11 }
 0x14e   : > { %2639 = shalt.err (!%p2636_p13)
}
 0x14f   : > { %s2640_s27 = scalar_lea.vmem %s644_s2, 16  ;;  %s2647_s6 = scalar_lea.vmem %s644_s2, 32 }
 0x150   : > { %p2641_p0 = scmp.ne.s32.totalorder %s644_s2, %s2640_s27  ;;  %p2648_p7 = scmp.lt.s32.totalorder %s644_s2, %s644_s2 }
 0x151   : > { %p2649_p9 = scmp.lt.s32.totalorder %s2647_s6, %s2640_s27 }
 0x152   : > { %p2643_p2 = pnand %p2641_p0, %p2960_p8 }
 0x153   : > { %p2650_p3 = por %p2649_p9, %p2648_p7 }
 0x154   : > { %p2644_p5 = pneg %p2643_p2 }
 0x156   : > { %p2651_p10 = pnand %p2650_p3, %p2644_p5 }
 0x158   : > { %2654 = shalt.err (!%p2651_p10)
}
 0x159   : > { %s3562_s15 = sld [smem:[#allocation40_spill]]  ;;  %s3563_s25 = sld [smem:[#allocation41_spill]] }
 0x15a   : > { %2148 = dma.hbm_to_vmem [thread:$0]  (!%p2944_p6), %s3509_s16, 16, %s644_s2, [#allocation29]  }
 0x15b   : > { %s1876_s0 = sadd.s32 4294967294, %s2779_s21   ;;  %s3220_s24 = sadd.s32 1, %s2779_s21  }
 0x15c   : > { %s49_s5 = sadd.s32 1, %s2775_s20  ;;  %s46_s1 = ssub.s32 %s2779_s21, %s3220_s24 }
 0x15d   : > { %p56_p8 = scmp.ne.s32.totalorder %s2775_s20, %s2771_s30  ;;  %p47_p1 = scmp.eq.s32.totalorder %s46_s1, 0 }
 0x15e   : > { %p57_p4 = scmp.eq.s32.totalorder %s2779_s21, 0  ;;  %p470_p5 = scmp.eq.s32.totalorder %s1876_s0, 5 }
 0x15f   : > { %p62_p11 = scmp.ne.s32.totalorder %s2771_s30, %s3562_s15  ;;  %p464_p12 = scmp.eq.s32.totalorder %s3563_s25, 5 }
 0x160   : > { %s3232_s19 = scalar_select %p47_p1, %s2775_s20, %s49_s5  }
 0x161   : > { %p58_p13 = por %p57_p4, %p56_p8  ;;  %p3564_p0 = scmp.eq.s32.totalorder %s3563_s25, 0 }
 0x162   : > { %p3240_p6 = por %p464_p12, %p56_p8  ;;  %p2170_p7 = scmp.lt.s32.totalorder %s2779_s21, 6 }
 0x163   : > { %p3236_p2 = por %p3564_p0, %p62_p11  ;;  %s660_s18 = sand.u32 1, %s2775_s20  }
 0x164   : > { %s3566_s2 = scalar_select %p3240_p6, 1, 0 }
 0x165   : > { %p3246_p9 = por %p470_p5, %p62_p11  ;;  %s1892_s22 = sshll.u32 %s660_s18, 1 }
 0x166   : > { %s1893_s17 = sshll.u32 %s2779_s21, 5  ;;  %s3568_s26 = sld [smem:[#allocation43_spill]] }
 0x167   : > { %s3567_s28 = scalar_select %p3246_p9, 1, 0 }
 0x168   : > { %s664_s15 = scalar_lea.vmem [#allocation7], %s1892_s22  ;;  %p3256_p3 = pnand %p2170_p7, %p58_p13 }
 0x169   : > { %s671_s25 = sshll.u32 %s664_s15, 4  ;;  %s661_s5 = scalar_lea.sflag [#allocation8], %s660_s18  ;;  %s3260_s25 = int_to_ptr.vmem [resolvable:$true] %s671_s25 }
 0x16a   : > { %p2657_p8 = pneg %p3256_p3 }
 0x16c   : > { %s3254_s23 = scalar_lea.hbm %s3568_s26, %s1893_s17  ;;  %s2660_s27 = scalar_lea.hbm %s3568_s26, 192 }
 0x16d   : > { %s2655_s1 = scalar_lea.hbm %s3254_s23, 32  ;;  %p2661_p11 = scmp.lt.u32.totalorder %s3254_s23, %s3568_s26 }
 0x16e   : > { %p2656_p10 = scmp.ne.s32.totalorder %s3254_s23, %s2655_s1  ;;  %p2662_p12 = scmp.lt.u32.totalorder %s2660_s27, %s2655_s1 }
 0x16f   : > { %p2664_p0 = scmp.lt.u32.totalorder %s2655_s1, %s3254_s23 }
 0x170   : > { %p2658_p1 = pnand %p2657_p8, %p2656_p10  ;;  %p2663_p13 = por %p2662_p12, %p2661_p11 }
 0x172   : > { %p2659_p4 = pneg %p2658_p1  ;;  %p2665_p5 = por %p2664_p0, %p2663_p13 }
 0x174   : > { %p2666_p7 = pnand %p2665_p5, %p2659_p4 }
 0x176   : > { %2669 = shalt.err (!%p2666_p7)
}
 0x177   : > { %s2670_s18 = scalar_lea.vmem %s3260_s25, 32  ;;  %s2798_s17 = smov [#allocation7]  }
 0x178   : > { %p2671_p10 = scmp.ne.s32.totalorder %s3260_s25, %s2670_s18  ;;  %s2675_s22 = sshll.u32 %s2798_s17, 4  ;;  %s2676_s22 = int_to_ptr.vmem [resolvable:$false] %s2675_s22 }
 0x179   : > { %s2677_s6 = scalar_lea.vmem %s2676_s22, 64  ;;  %p2678_p6 = scmp.lt.s32.totalorder %s3260_s25, %s2676_s22 }
 0x17a   : > { %p2673_p1 = pnand %p2671_p10, %p2657_p8  ;;  %p2679_p11 = scmp.lt.s32.totalorder %s2677_s6, %s2670_s18 }
 0x17c   : > { %p2674_p9 = pneg %p2673_p1  ;;  %p2680_p12 = por %p2679_p11, %p2678_p6 }
 0x17e   : > { %p2681_p13 = pnand %p2680_p12, %p2674_p9 }
 0x180   : > { %2684 = shalt.err (!%p2681_p13)
}
 0x181   : > { %2152 = dma.hbm_to_vmem [thread:$0]  (!%p3256_p3), %s3254_s23, 32, %s3260_s25, %s661_s5  }
 0x182   : > { %s3570_s1 = sld [smem:[#allocation42_spill]] }
 0x188   : > { %p3571_p4 = scmp.ne.s32.totalorder %s3570_s1, 0 }
 0x189   : > { %s3290_s27 = sand.u32 (!%p3571_p4), 1, %s2771_s30  }
 0x18a   : > { %680 = sbr.rel (%p3571_p4) target bundleno = 2758 (0xac6), region = 96  ;;  %s1895_s15 = sshll.u32 (!%p3571_p4), %s3290_s27, 1 }
 0x18b   : > { %s683_s17 = scalar_lea.sflag (!%p3571_p4), [#allocation8], %s3290_s27  ;;  %s3294_s18 = scalar_lea.vmem (!%p3571_p4), [#allocation7], %s1895_s15 }
 0x191   : > { %2730 = dma.done.wait (%p3236_p2), %s683_s17, 32  }
 0x192   : > { %2732 = vsyncadd (%p3236_p2), %s683_s17, 4294967264  ;;  %s3572_s0 = sld [smem:[#allocation41_spill]] }
 0x198   : > { %p3573_p6 = scmp.eq.s32.totalorder %s3572_s0, 0 }
 0x19a   : > { %2734 = dma.done.wait (%p3573_p6), [#allocation11], 768   ;;  %p3574_p9 = pmov %p3573_p6 }
 0x19b   : > { %p3575_p3 = pmov %p3573_p6 }
 0x19c   : > { %2736 = vsyncadd (%p3574_p9), [#allocation11], 4294966528 }
 0x19d   : > { %2738 = dma.done.wait (%p3575_p3), [#allocation14], 512   ;;  %p3576_p8 = pmov %p3575_p3 }
 0x19e   : > { %p3577_p0 = pmov %p3575_p3 }
 0x19f   : > { %2740 = vsyncadd (%p3576_p8), [#allocation14], 4294966784 }
 0x1a0   : > { %2742 = dma.done.wait (%p3577_p0), [#allocation17], 32   ;;  %p3578_p5 = pmov %p3577_p0 }
 0x1a1   : > { %p3579_p2 = pmov %p3577_p0 }
 0x1a2   : > { %2744 = vsyncadd (%p3578_p5), [#allocation17], 4294967264 }
 0x1a3   : > { %2746 = dma.done.wait (%p3579_p2), [#allocation20], 272   ;;  %p3580_p7 = pmov %p3577_p0 }
 0x1a4   : > { %p3581_p10 = pmov %p3577_p0 }
 0x1a5   : > { %2748 = vsyncadd (%p3580_p7), [#allocation20], 4294967024 }
 0x1a6   : > { %2750 = dma.done.wait (%p3581_p10), [#allocation23], 272   ;;  %p3582_p1 = pmov %p3577_p0 }
 0x1a7   : > { %p3583_p11 = pmov %p3577_p0 }
 0x1a8   : > { %2752 = vsyncadd (%p3582_p1), [#allocation23], 4294967024 }
 0x1a9   : > { %2754 = dma.done.wait (%p3583_p11), [#allocation26], 32   ;;  %p3584_p12 = pmov %p3577_p0 }
 0x1aa   : > { %p3585_p13 = pmov %p3577_p0 }
 0x1ab   : > { %2756 = vsyncadd (%p3584_p12), [#allocation26], 4294967264 }
 0x1ac   : > { %2758 = dma.done.wait (%p3585_p13), [#allocation29], 16   ;;  %p3586_p4 = pmov %p3577_p0 }
 0x1ad   : > { %s3328_s29 = scalar_lea.vmem [#allocation30], %s1895_s15  ;;  %p3587_p6 = scmp.ne.s32.totalorder %s3572_s0, 0 }
 0x1ae   : > { %2760 = vsyncadd (%p3586_p4), [#allocation29], 4294967280  ;;  %s3588_s5 = sld [smem:[#allocation49_spill]] (!%p3587_p6)  ;;  %vm802_vm0 = vcmask (!%p3587_p6), 254976   ;;  %v798_v2 = vld [vmem:[#allocation10] sm:$0xff] (!%p3587_p6)  ;;  %v799_v3 = vld [vmem:[#allocation10 + $0x8] sm:$0xff] (!%p3587_p6) }
 0x1af   : > { %797 = sbr.rel (%p3587_p6) target bundleno = 885 (0x375), region = 156  ;;  %vm805_vm1 = vcmask (!%p3587_p6), 261120   ;;  %v800_v4 = vld [vmem:[#allocation10 + $0x10] sm:$0xff] (!%p3587_p6)  ;;  %v837_v7 = vpack.c.bf16 (!%p3587_p6), %v799_v3, %v798_v2  ;;  %v801_v8 = vld [vmem:[#allocation10 + $0x18] sm:$0xff] (!%p3587_p6)  ;;  %v2799_v9 = vmov (!%p3587_p6), 0.0   ;;  %vm829_vm2 = vcmask (!%p3587_p6), 1041409  }
 0x1b0   : > { %v806_v5 = vsel (!%p3587_p6), %vm805_vm1, %v798_v2, 0.0  ;;  %v807_v6 = vsel (!%p3587_p6), %vm805_vm1, %v799_v3, 0.0  ;;  %803 = vst.msk [vmem:[#allocation2] sm:$0x3] (!%p3587_p6), %vm802_vm0, %v2799_v9  ;;  %804 = vst.msk [vmem:[#allocation3] sm:$0x3] (!%p3587_p6), %vm802_vm0, %v2799_v9  ;;  %v838_v15 = vpack.c.bf16 (!%p3587_p6), %v801_v8, %v800_v4 }
 0x1b1   : > { %v815_v10 = vsel (!%p3587_p6), %vm805_vm1, %v800_v4, 0.0  ;;  %v808_v11 = vadd.f32 (!%p3587_p6), %v807_v6, %v806_v5  ;;  %v816_v12 = vsel (!%p3587_p6), %vm805_vm1, %v801_v8, 0.0  ;;  %1985 = vmatprep.mubr.msk.bf16.mxu0 (!%p3587_p6), %vm805_vm1, %v837_v7  ;;  %v2243_v30 = vld [vmem:[#allocation19] sm:$0xff] (!%p3587_p6)   ;;  %v2244_v31 = vld [vmem:[#allocation19 + $0x8] sm:$0xff] (!%p3587_p6)   ;;  %v1911_v32 = vld [vmem:[#allocation18] ss:$0 sm:$0xff] (!%p3587_p6) }
 0x1b2   : > { %v817_v13 = vadd.f32 (!%p3587_p6), %v816_v12, %v815_v10  ;;  %1989 = vmatprep.subr.bf16.mxu1 (!%p3587_p6), %v2243_v30  ;;  %v1916_v47 = vld [vmem:[#allocation21] ss:$0 sm:$0xff] (!%p3587_p6) }
 0x1b3   : > { %v809_v14 = vrot.slane (!%p3587_p6), %v808_v11, 4  ;;  %1990 = vmatpush3.bf16.msra.mxu1 (!%p3587_p6), %v2243_v30 }
 0x1b4   : > { %v2241_v0 = vld [vmem:[%s3588_s5] sm:$0xff] (!%p3587_p6)   ;;  %v2242_v1 = vld [vmem:[%s3588_s5 + $0x8] sm:$0xff] (!%p3587_p6)   ;;  %v818_v16 = vrot.slane (!%p3587_p6), %v817_v13, 4  ;;  %1991 = vmatprep.subr.bf16.mxu1 (!%p3587_p6), %v2244_v31 }
 0x1b5   : > { %1981 = vmatprep.subr.bf16.mxu0 (!%p3587_p6), %v2241_v0  ;;  %v810_v17 = vadd.f32 (!%p3587_p6), %v809_v14, %v808_v11 }
 0x1b6   : > { %1982 = vmatpush3.bf16.msra.mxu0 %v2241_v0  ;;  %v819_v18 = vadd.f32 %v818_v16, %v817_v13 }
 0x1b7   : > { %1983 = vmatprep.subr.bf16.mxu0 %v2242_v1  ;;  %v811_v19 = vrot.slane %v810_v17, 2  ;;  %1992 = vmatpush3.bf16.msra.mxu1 %v2244_v31 }
 0x1b8   : > { %v820_v20 = vrot.slane %v819_v18, 2 }
 0x1b9   : > { %v812_v21 = vadd.f32 %v811_v19, %v810_v17 }
 0x1ba   : > { %1984 = vmatpush3.bf16.msra.mxu0 %v2242_v1  ;;  %v821_v22 = vadd.f32 %v820_v20, %v819_v18 }
 0x1bb   : > { %v813_v23 = vrot.slane %v812_v21, 1 }
 0x1bc   : > { %v822_v24 = vrot.slane %v821_v22, 1 }
 0x1bd   : > { %1986 = vmatmul.mubr.msk.bf16.vlgmr.msra.gmra.mrb[0].mxu0 %vm805_vm1, %v838_v15  ;;  %v814_v25 = vadd.f32 %v813_v23, %v812_v21 }
 0x1be   : > { %v823_v26 = vadd.f32 %v822_v24, %v821_v22 }
 0x1bf   : > { %v825_v27 = vmul.f32 0.0625, %v814_v25 }
 0x1c0   : > { %v826_v28 = vmul.f32 0.0625, %v823_v26 }
 0x1c2   : > { %v830_v29 = vsel %vm829_vm2, %v826_v28, %v825_v27 }
 0x1c3   : > { %832 = vst.msk [vmem:[#allocation4] sm:$0x3] %vm802_vm0, %v830_v29 }
 0x290   : > { %v1987_v33 = vpop.f32.mrb[0].mxu0 }
 0x291   : > { %v907_v34 = vadd.f32 %v1987_v33, %v1911_v32  ;;  %v898_v35 = vpop.f32.mrb[1].mxu0 }
 0x292   : > { %v899_v36 = vadd.f32 %v1911_v32, %v898_v35  ;;  %v1988_v37 = vpop.f32.mrb[2].mxu0 }
 0x293   : > { %v915_v38 = vmax.f32 %v907_v34, 0.0  ;;  %v910_v39 = vadd.f32 %v1988_v37, %v1911_v32  ;;  %v901_v40 = vpop.f32.mrb[3].mxu0 }
 0x294   : > { %v913_v41 = vmax.f32 %v899_v36, 0.0  ;;  %v902_v42 = vadd.f32 %v1911_v32, %v901_v40 }
 0x295   : > { %999 = vst.msk [vmem:[#allocation5 + $0x10] sm:$0xff] %vm805_vm1, %v915_v38  ;;  %v916_v43 = vmax.f32 %v910_v39, 0.0 }
 0x296   : > { %997 = vst.msk [vmem:[#allocation5] sm:$0xff] %vm805_vm1, %v913_v41  ;;  %v914_v44 = vmax.f32 %v902_v42, 0.0 }
 0x297   : > { %v922_v45 = vpack.c.bf16 %v916_v43, %v915_v38  ;;  %1000 = vst.msk [vmem:[#allocation5 + $0x18] sm:$0xff] %vm805_vm1, %v916_v43 }
 0x298   : > { %998 = vst.msk [vmem:[#allocation5 + $0x8] sm:$0xff] %vm805_vm1, %v914_v44  ;;  %v921_v46 = vpack.c.bf16 %v914_v44, %v913_v41 }
 0x29a   : > { %1993 = vmatprep.mubr.msk.bf16.mxu1 %vm805_vm1, %v921_v46 }
 0x29b   : > { %1994 = vmatmul.mubr.msk.bf16.vlgmr.msra.gmra.mrb[0].mxu1 %vm805_vm1, %v922_v45 }
 0x36e   : > { %v1995_v48 = vpop.f32.mrb[0].mxu1 }
 0x36f   : > { %v991_v49 = vadd.f32 %v1995_v48, %v1916_v47  ;;  %v982_v50 = vpop.f32.mrb[1].mxu1 }
 0x370   : > { %v983_v51 = vadd.f32 %v1916_v47, %v982_v50  ;;  %v1996_v52 = vpop.f32.mrb[2].mxu1 }
 0x371   : > { %1003 = vst.msk [vmem:[#allocation6 + $0x10] sm:$0xff] %vm805_vm1, %v991_v49  ;;  %v994_v53 = vadd.f32 %v1996_v52, %v1916_v47  ;;  %v985_v54 = vpop.f32.mrb[3].mxu1 }
 0x372   : > { %1001 = vst.msk [vmem:[#allocation6] sm:$0xff] %vm805_vm1, %v983_v51  ;;  %v986_v55 = vadd.f32 %v1916_v47, %v985_v54 }
 0x373   : > { %1004 = vst.msk [vmem:[#allocation6 + $0x18] sm:$0xff] %vm805_vm1, %v994_v53 }
 0x374   : > { %1002 = vst.msk [vmem:[#allocation6 + $0x8] sm:$0xff] %vm805_vm1, %v986_v55 }
 0x375 PF: > { %v2245_v56 = vld [vmem:[#allocation13] sm:$0xff]   ;;  %v2800_v57 = vmov 0.0   ;;  %v2246_v58 = vld [vmem:[#allocation12] sm:$0xff]   ;;  %v2247_v59 = vld [vmem:[#allocation13 + $0x8] sm:$0xff]   ;;  %vm2801_vm3 = vmmov 0   ;;  %vm1029_vm4 = vcmask 261120   ;;  %v1384_v53 = vlaneseq }
 0x376   : > { %1997 = vmatprep.subr.bf16.mxu0 %v2800_v57  ;;  %2005 = vmatprep.subr.bf16.mxu1 %v2800_v57  ;;  %v2248_v60 = vld [vmem:[#allocation12 + $0x8] sm:$0xff]   ;;  %v1005_v61 = vld [vmem:[%s3294_s18] sm:$0x3]  ;;  %v1006_v62 = vld [vmem:[#allocation4] sm:$0x3]  ;;  %s2802_s1 = smov 64  }
 0x377   : > { %1998 = vmatpush3.bf16.msra.mxu0 %v2245_v56  ;;  %2001 = vmatprep.mubr.msk.bf16.mxu0 %vm2801_vm3, %v2800_v57  ;;  %v1016_v63 = vpack.c.bf16 %v1005_v61, %v1005_v61  ;;  %v1011_v0 = vpack.c.bf16 %v1006_v62, %v1006_v62  ;;  %v2249_v1 = vld [vmem:[#allocation15] sm:$0xff]   ;;  %v2250_v2 = vld [vmem:[#allocation15 + $0x8] sm:$0xff]   ;;  %v1128_v3 = vld [vmem:[#allocation2] sm:$0x3]  ;;  %s2803_s15 = smov 32   ;;  %s3589_s0 = sld [smem:[#allocation50_spill]] }
 0x378   : > { %2006 = vmatpush3.bf16.msra.mxu1 %v2246_v58  ;;  %1999 = vmatprep.subr.bf16.mxu0 %v2800_v57  ;;  %v1133_v4 = vpack.c.bf16 %v1128_v3, %v1128_v3  ;;  %v1930_v15 = vld [vmem:[#allocation16] ss:$0 sm:$0xff]  ;;  %v1205_v22 = vld [vmem:[#allocation3] sm:$0x3]  ;;  %v2253_v41 = vld [vmem:[#allocation24] sm:$0xff]   ;;  %v1385_v55 = vshrl.u32 %v1384_v53, 7 }
 0x379   : > { %2007 = vmatprep.subr.bf16.mxu1 %v2800_v57  ;;  %2009 = vmatprep.mubr.msk.bf16.mxu1 %vm2801_vm3, %v2800_v57  ;;  %v2254_v42 = vld [vmem:[#allocation24 + $0x8] sm:$0xff]   ;;  %v1931_v43 = vld [vmem:[#allocation22] ss:$0 sm:$0xff]  ;;  %v2804_v51 = vmov 1966171168   ;;  %s2805_s6 = smov 96  }
 0x37a   : > { %v1382_v52 = vunpack.c.l.s4 %v2804_v51  ;;  %v1935_v56 = vld [vmem:[#allocation25] ss:$0 sm:$0xff]  ;;  %s3591_s18 = sld [smem:[#allocation51_spill]]  ;;  %vm1231_vm5 = vcmask 254976   ;;  %vm1540_vm6 = vcmask 1041409   ;;  %s3594_s22 = sld [smem:[#allocation53_spill]] }
 0x37b   : > { %2000 = vmatpush3.bf16.msra.mxu0 %v2247_v59  ;;  %s3595_s5 = sld [smem:[#allocation54_spill]]  ;;  %s1669_s25 = scalar_lea.sflag [#allocation9], %s3290_s27 }
 0x37c   : > { %2008 = vmatpush3.bf16.msra.mxu1 %v2248_v60  ;;  %2013 = vmatprep.subr.bf16.mxu0 %v2800_v57  ;;  %v1383_v54 = vunpack.c.0.s8 %v1382_v52  ;;  %p3596_p3 = scmp.ne.s32.totalorder %s3566_s2, 0 }
 0x37d   : > { %2021 = vmatprep.subr.bf16.mxu1 %v2800_v57  ;;  %s3590_s23 = smov %s3589_s0  ;;  %v2251_v34 = vld [vmem:[%s3589_s0] sm:$0xff]   ;;  %s1682_s0 = sshll.u32 %s3328_s29, 4  ;;  %s3451_s0 = int_to_ptr.vmem [resolvable:$true] %s1682_s0 }
 0x37e   : > { %2002 = vmatmul.mubr.msk.bf16.vlgmr.msra.gmra.mrb[0].mxu0 %vm1029_vm4, %v1016_v63  ;;  %v2252_v35 = vld [vmem:[%s3590_s23 + $0x8] sm:$0xff]   ;;  %v1386_v58 = vsub.s32 %v1383_v54, %v1385_v55 }
 0x37f   : > { %2010 = vmatmul.mubr.msk.bf16.vlgmr.msra.gmra.mrb[0].mxu1 %vm1029_vm4, %v1011_v0  ;;  %2014 = vmatpush3.bf16.msra.mxu0 %v2249_v1  ;;  %v1405_v0 = vsub.s32 0, %v1385_v55 }
 0x380   : > { %2015 = vmatprep.subr.bf16.mxu0 %v2800_v57  ;;  %2017 = vmatprep.mubr.msk.bf16.mxu0 %vm2801_vm3, %v2800_v57 }
 0x381   : > { %2025 = vmatprep.mubr.msk.bf16.mxu1 %vm2801_vm3, %v2800_v57  ;;  %2022 = vmatpush3.bf16.msra.mxu1 %v2251_v34 }
 0x382   : > { %2023 = vmatprep.subr.bf16.mxu1 %v2800_v57 }
 0x383   : > { %2016 = vmatpush3.bf16.msra.mxu0 %v2250_v2 }
 0x384   : > { %2029 = vmatprep.subr.bf16.mxu0 %v2800_v57 }
 0x385   : > { %2024 = vmatpush3.bf16.msra.mxu1 %v2252_v35 }
 0x386   : > { %2018 = vmatmul.mubr.msk.bf16.vlgmr.msra.gmra.mrb[4].mxu0 %vm1029_vm4, %v1133_v4  ;;  %2037 = vmatprep.subr.bf16.mxu1 %v2800_v57  ;;  %v1376_v4 = vld [vmem:[#allocation6] sm:$0xff] }
 0x387   : > { %2033 = vmatprep.mubr.msk.bf16.mxu0 %vm2801_vm3, %v2800_v57  ;;  %2030 = vmatpush3.bf16.msra.mxu0 %v2253_v41 }
 0x388   : > { %2031 = vmatprep.subr.bf16.mxu0 %v2800_v57 }
 0x38b   : > { %2032 = vmatpush3.bf16.msra.mxu0 %v2254_v42 }
 0x38c   : > { %2045 = vmatprep.subr.bf16.mxu0 %v2800_v57 }
 0x451   : > { %v1067_v5 = vpop.f32.mrb[0].mxu0 }
 0x452   : > { %v2003_v6 = vpop.f32.mrb[1].mxu0  ;;  %v1122_v7 = vpop.f32.mrb[0].mxu1 }
 0x453   : > { %v1123_v8 = vadd.f32 %v1122_v7, %v1067_v5  ;;  %v1070_v9 = vpop.f32.mrb[2].mxu0  ;;  %v2011_v10 = vpop.f32.mrb[1].mxu1  ;;  %v1377_v5 = vld [vmem:[#allocation6 + $0x8] sm:$0xff] }
 0x454   : > { %v2004_v11 = vpop.f32.mrb[3].mxu0  ;;  %v1125_v12 = vpop.f32.mrb[2].mxu1  ;;  %v1379_v9 = vld [vmem:[#allocation6 + $0x18] sm:$0xff] }
 0x455   : > { %v2012_v13 = vpop.f32.mrb[3].mxu1 }
 0x459   : > { %v1183_v14 = vpop.f32.mrb[4].mxu0 }
 0x45a   : > { %v1189_v16 = vadd.f32 %v1183_v14, %v1123_v8  ;;  %v2019_v17 = vpop.f32.mrb[5].mxu0  ;;  %v1378_v8 = vld [vmem:[#allocation6 + $0x10] sm:$0xff] }
 0x45b   : > { %v1186_v18 = vpop.f32.mrb[6].mxu0 }
 0x45c   : > { %v1197_v19 = vadd.f32 %v1930_v15, %v1189_v16  ;;  %v2020_v20 = vpop.f32.mrb[7].mxu0  ;;  %v1939_v18 = vld [vmem:[#allocation27] ss:$0 sm:$0xff] }
 0x45e   : > { %2259 = vtanh.f32 %v1197_v19  ;;  %v1198_v23 = vsub.f32 0.0, %v1197_v19 }
 0x460   : > { %v1199_v24 = vmul.f32 1.442695, %v1198_v23 }
 0x462   : > { %2261 = vpow2.f32 %v1199_v24 }
 0x468   : > { %v2260_v21 = vpop.eup %2259 }
 0x469   : > { %1212 = vrot.lane.b32.xlu0 %v2260_v21, %s2802_s1 }
 0x46c   : > { %v2262_v25 = vpop.eup %2261 }
 0x46d   : > { %1207 = vrot.lane.b32.xlu0 %v1205_v22, %s2803_s15  ;;  %v1201_v26 = vadd.f32 1.0, %v2262_v25 }
 0x46f   : > { %2263 = vrcp.f32 %v1201_v26 }
 0x479   : > { %v2264_v27 = vpop.eup %2263 }
 0x4db   : > { %v1213_v28 = vpop.permute.xlu0 %1212 }
 0x4dc   : > { %v1215_v29 = vmul.f32 %v2264_v27, %v1213_v28  ;;  %v2255_v28 = vld [vmem:[%s3591_s18] sm:$0xff]  }
 0x4de   : > { %1217 = vrot.lane.b32.xlu1 %v1215_v29, %s2803_s15  ;;  %v2256_v29 = vld [vmem:[%s3591_s18 + $0x8] sm:$0xff]  }
 0x4df   : > { %v1208_v30 = vpop.permute.xlu0 %1207 }
 0x4e0   : > { %v1210_v31 = vmul.f32 %v2264_v27, %v1208_v30 }
 0x550   : > { %v1218_v32 = vpop.permute.xlu1 %1217 }
 0x551   : > { %v3381_v33 = vadd.f32 %v1218_v32, %v1210_v31 }
 0x553   : > { %2265 = vtanh.f32 %v3381_v33 }
 0x55d   : > { %v2266_v36 = vpop.eup %2265 }
 0x55e   : > { %1223 = vrot.lane.b32.xlu1 %v2266_v36, %s2802_s1  ;;  %s3593_s1 = sld [smem:[#allocation41_spill]] }
 0x564   : > { %s1949_s17 = sshll.u32 %s3593_s1, 5  ;;  %s2806_s1 = smov [#allocation30]  }
 0x5d0   : > { %v1224_v37 = vpop.permute.xlu1 %1223 }
 0x5d1   : > { %v3392_v38 = vmul.f32 %v2264_v27, %v1224_v37 }
 0x5d3   : > { %v1242_v39 = vpack.c.bf16 %v3392_v38, %v3392_v38 }
 0x5d5   : > { %1251 = vrot.lane.b32.xlu0 %v1242_v39, %s2803_s15 }
 0x647   : > { %v1252_v40 = vpop.permute.xlu0 %1251 }
 0x648   : > { %2026 = vmatmul.mubr.msk.bf16.vlgmr.msra.gmra.mrb[4].mxu1 %vm1029_vm4, %v1252_v40 }
 0x649   : > { %2041 = vmatprep.mubr.msk.bf16.mxu1 %vm2801_vm3, %v2800_v57  ;;  %2038 = vmatpush3.bf16.msra.mxu1 %v2255_v28 }
 0x64a   : > { %2039 = vmatprep.subr.bf16.mxu1 %v2800_v57 }
 0x64d   : > { %2040 = vmatpush3.bf16.msra.mxu1 %v2256_v29 }
 0x71b   : > { %v1302_v44 = vpop.f32.mrb[4].mxu1 }
 0x71c   : > { %v1303_v45 = vadd.f32 %v1931_v43, %v1302_v44  ;;  %v2027_v46 = vpop.f32.mrb[5].mxu1 }
 0x71d   : > { %v1305_v47 = vpop.f32.mrb[6].mxu1 }
 0x71e   : > { %2267 = vtanh.f32 %v1303_v45  ;;  %v2028_v48 = vpop.f32.mrb[7].mxu1 }
 0x728   : > { %v3402_v49 = vpop.eup %2267 }
 0x729   : > { %v1313_v50 = vpack.c.bf16 %v3402_v49, %v3402_v49 }
 0x72b   : > { %2034 = vmatmul.mubr.msk.bf16.vlgmr.msra.gmra.mrb[8].mxu0 %vm1029_vm4, %v1313_v50 }
 0x72c   : > { %2049 = vmatprep.mubr.msk.bf16.mxu0 %vm2801_vm3, %v2800_v57 }
 0x7fe   : > { %v1370_v59 = vpop.f32.mrb[8].mxu0 }
 0x7ff   : > { %v1371_v60 = vadd.f32 %v1935_v56, %v1370_v59  ;;  %v2035_v61 = vpop.f32.mrb[9].mxu0 }
 0x800   : > { %v1373_v62 = vpop.f32.mrb[10].mxu0 }
 0x801   : > { %v1387_v63 = vrot.slane %v1371_v60, %v1386_v58  ;;  %v2036_v1 = vpop.f32.mrb[11].mxu0 }
 0x803   : > { %v1388_v2 = vcombine.high %v1387_v63, %v1387_v63  ;;  %v1395_v3 = vrot.slane %v1387_v63, %v1386_v58 }
 0x805   : > { %v1402_v6 = vrot.slane %v1388_v2, %v1386_v58  ;;  %v1406_v7 = vrot.slane %v1395_v3, %v1405_v0 }
 0x807   : > { %v1410_v10 = vrot.slane %v1402_v6, %v1405_v0  ;;  %v1413_v11 = vadd.f32 %v1406_v7, %v1376_v4  ;;  %v1414_v12 = vadd.f32 %v1406_v7, %v1377_v5 }
 0x809   : > { %v1415_v13 = vadd.f32 %v1410_v10, %v1378_v8  ;;  %v1416_v14 = vadd.f32 %v1410_v10, %v1379_v9  ;;  %2269 = vtanh.f32 %v1413_v11 }
 0x80a   : > { %2271 = vtanh.f32 %v1414_v12 }
 0x80b   : > { %2273 = vtanh.f32 %v1415_v13 }
 0x80c   : > { %2275 = vtanh.f32 %v1416_v14 }
 0x813   : > { %v2270_v15 = vpop.eup %2269 }
 0x814   : > { %v2272_v16 = vpop.eup %2271  ;;  %v1428_v25 = vmul.f32 %v2270_v15, %v1939_v18  ;;  %v1492_v15 = vld [vmem:[#allocation5 + $0x10] sm:$0xff] }
 0x815   : > { %v2274_v17 = vpop.eup %2273  ;;  %v1429_v23 = vmul.f32 %v2272_v16, %v1939_v18  ;;  %v1493_v16 = vld [vmem:[#allocation5 + $0x18] sm:$0xff] }
 0x816   : > { %v2276_v19 = vpop.eup %2275  ;;  %v1430_v20 = vmul.f32 %v2274_v17, %v1939_v18  ;;  %v1432_v27 = vsel %vm1029_vm4, %v1428_v25, 0.0 }
 0x817   : > { %v1431_v21 = vmul.f32 %v2276_v19, %v1939_v18  ;;  %v1435_v26 = vsel %vm1029_vm4, %v1429_v23, 0.0  ;;  %v1491_v23 = vld [vmem:[#allocation5 + $0x8] sm:$0xff] }
 0x818   : > { %v1438_v22 = vsel %vm1029_vm4, %v1430_v20, 0.0 }
 0x819   : > { %v1441_v24 = vsel %vm1029_vm4, %v1431_v21, 0.0  ;;  %1439 = vadd.xlane.f32.xlu1 %v1438_v22  ;;  %v1490_v22 = vld [vmem:[#allocation5] sm:$0xff] }
 0x81a   : > { %1442 = vadd.xlane.f32.xlu0 %v1441_v24 }
 0x81d   : > { %1436 = vadd.xlane.f32.xlu1 %v1435_v26 }
 0x81e   : > { %1433 = vadd.xlane.f32.xlu0 %v1432_v27 }
 0x82e   : > { %1234 = vrot.lane.b32.xlu1 %v3392_v38, %s2803_s15  ;;  %s2685_s15 = scalar_lea.vmem %s3451_s0, 32 }
 0x82f   : > { %p2686_p9 = scmp.ne.s32.totalorder %s3451_s0, %s2685_s15 }
 0x831   : > { %p2687_p8 = pnand %p2686_p9, %p3596_p3 }
 0x833   : > { %p2688_p0 = pneg %p2687_p8 }
 0x834   : > { %1228 = vrot.lane.b32.xlu0 %v3381_v33, %s2805_s6  ;;  %s3592_s6 = sld [smem:[#allocation52_spill]] }
 0x8a6   : > { %v1440_v30 = vpop.xlane.xlu1 %1439 }
 0x8a7   : > { %v1443_v31 = vpop.xlane.xlu0 %1442 }
 0x8a8   : > { %v1451_v32 = vmax.f32 %v1440_v30, %v1443_v31 }
 0x8aa   : > { %v1452_v34 = vrot.slane %v1451_v32, 4  ;;  %v1437_v35 = vpop.xlane.xlu1 %1436 }
 0x8ab   : > { %v1434_v36 = vpop.xlane.xlu0 %1433 }
 0x8ac   : > { %v1453_v37 = vmax.f32 %v1451_v32, %v1452_v34  ;;  %v1444_v33 = vmax.f32 %v1434_v36, %v1437_v35 }
 0x8ae   : > { %v1454_v38 = vrot.slane %v1453_v37, 2  ;;  %v1445_v39 = vrot.slane %v1444_v33, 4  ;;  %v1235_v40 = vpop.permute.xlu1 %1234 }
 0x8af   : > { %v1229_v41 = vpop.permute.xlu0 %1228  ;;  %1237 = vst.msk [vmem:[#allocation2] sm:$0x3] %vm1231_vm5, %v1235_v40 }
 0x8b0   : > { %v1455_v42 = vmax.f32 %v1453_v37, %v1454_v38  ;;  %v1446_v43 = vmax.f32 %v1444_v33, %v1445_v39  ;;  %1232 = vst.msk [vmem:[#allocation3] sm:$0x3] %vm1231_vm5, %v1229_v41 }
 0x8b2   : > { %v1456_v44 = vrot.slane %v1455_v42, 1  ;;  %v1447_v45 = vrot.slane %v1446_v43, 2 }
 0x8b4   : > { %v1457_v46 = vmax.f32 %v1455_v42, %v1456_v44  ;;  %v1448_v47 = vmax.f32 %v1446_v43, %v1447_v45  ;;  %v1517_v44 = vrot.slane %v3402_v49, 1 }
 0x8b6   : > { %v1460_v48 = vsub.f32 %v1440_v30, %v1457_v46  ;;  %v1461_v50 = vsub.f32 %v1443_v31, %v1457_v46  ;;  %v1449_v51 = vrot.slane %v1448_v47, 1 }
 0x8b8   : > { %v1466_v52 = vmul.f32 1.442695, %v1460_v48  ;;  %v1468_v53 = vmul.f32 1.442695, %v1461_v50  ;;  %v1450_v54 = vmax.f32 %v1448_v47, %v1449_v51 }
 0x8ba   : > { %2277 = vpow2.f32 %v1466_v52  ;;  %v1458_v55 = vsub.f32 %v1434_v36, %v1450_v54  ;;  %v1459_v56 = vsub.f32 %v1437_v35, %v1450_v54 }
 0x8bb   : > { %2279 = vpow2.f32 %v1468_v53 }
 0x8bc   : > { %v1462_v58 = vmul.f32 1.442695, %v1458_v55  ;;  %v1464_v59 = vmul.f32 1.442695, %v1459_v56 }
 0x8be   : > { %2281 = vpow2.f32 %v1462_v58  ;;  %v2257_v58 = vld [vmem:[%s3592_s6] sm:$0xff]  }
 0x8bf   : > { %2283 = vpow2.f32 %v1464_v59  ;;  %2046 = vmatpush3.bf16.msra.mxu0 %v2257_v58  ;;  %v1940_v59 = vld [vmem:[#allocation28] ss:$0 sm:$0xff] }
 0x8c0   : > { %2047 = vmatprep.subr.bf16.mxu0 %v2800_v57  ;;  %v1944_v57 = vld [vmem:[%s3594_s22] ss:$0 sm:$0xff]  ;;  %s2689_s22 = sshll.u32 %s2806_s1, 4  ;;  %s2690_s22 = int_to_ptr.vmem [resolvable:$false] %s2689_s22 }
 0x8c1   : > { %s2691_s4 = scalar_lea.vmem %s2690_s22, 64  ;;  %p2692_p5 = scmp.lt.s32.totalorder %s3451_s0, %s2690_s22 }
 0x8c2   : > { %p2693_p2 = scmp.lt.s32.totalorder %s2691_s4, %s2685_s15 }
 0x8c4   : > { %v2278_v60 = vpop.eup %2277  ;;  %p2694_p7 = por %p2693_p2, %p2692_p5 }
 0x8c5   : > { %v2280_v61 = vpop.eup %2279 }
 0x8c6   : > { %v1477_v62 = vadd.f32 %v2280_v61, %v2278_v60  ;;  %p2695_p10 = pnand %p2694_p7, %p2688_p0 }
 0x8c8   : > { %v2282_v63 = vpop.eup %2281  ;;  %v1478_v0 = vrot.slane %v1477_v62, 4 }
 0x8c9   : > { %v2284_v1 = vpop.eup %2283 }
 0x8ca   : > { %v1479_v2 = vadd.f32 %v1478_v0, %v1477_v62  ;;  %v1470_v3 = vadd.f32 %v2284_v1, %v2282_v63 }
 0x8cc   : > { %v1480_v4 = vrot.slane %v1479_v2, 2  ;;  %v1471_v5 = vrot.slane %v1470_v3, 4 }
 0x8ce   : > { %v1481_v6 = vadd.f32 %v1480_v4, %v1479_v2  ;;  %v1472_v7 = vadd.f32 %v1471_v5, %v1470_v3 }
 0x8d0   : > { %v1482_v8 = vrot.slane %v1481_v6, 1  ;;  %v1473_v9 = vrot.slane %v1472_v7, 2 }
 0x8d2   : > { %v1483_v10 = vadd.f32 %v1482_v8, %v1481_v6  ;;  %v1474_v11 = vadd.f32 %v1473_v9, %v1472_v7 }
 0x8d4   : > { %2285 = vrcp.f32 %v1483_v10  ;;  %v1475_v12 = vrot.slane %v1474_v11, 1 }
 0x8d6   : > { %v1476_v13 = vadd.f32 %v1475_v12, %v1474_v11 }
 0x8d8   : > { %2287 = vrcp.f32 %v1476_v13 }
 0x8de   : > { %v2286_v14 = vpop.eup %2285 }
 0x8df   : > { %v1488_v17 = vmul.f32 %v2286_v14, %v2278_v60  ;;  %v1489_v18 = vmul.f32 %v2286_v14, %v2280_v61 }
 0x8e1   : > { %v1496_v19 = vmul.f32 %v1492_v15, %v1488_v17  ;;  %v1497_v20 = vmul.f32 %v1493_v16, %v1489_v18 }
 0x8e2   : > { %v2288_v21 = vpop.eup %2287 }
 0x8e3   : > { %v1507_v24 = vsel %vm1029_vm4, %v1496_v19, 0.0  ;;  %v1508_v25 = vsel %vm1029_vm4, %v1497_v20, 0.0  ;;  %v1485_v26 = vmul.f32 %v2288_v21, %v2282_v63  ;;  %v1486_v27 = vmul.f32 %v2288_v21, %v2284_v1 }
 0x8e4   : > { %v1509_v28 = vadd.f32 %v1508_v25, %v1507_v24 }
 0x8e5   : > { %v1494_v29 = vmul.f32 %v1490_v22, %v1485_v26  ;;  %v1495_v30 = vmul.f32 %v1491_v23, %v1486_v27 }
 0x8e6   : > { %v1510_v31 = vrot.slane %v1509_v28, 4 }
 0x8e7   : > { %v1498_v32 = vsel %vm1029_vm4, %v1494_v29, 0.0  ;;  %v1499_v34 = vsel %vm1029_vm4, %v1495_v30, 0.0 }
 0x8e8   : > { %v1511_v35 = vadd.f32 %v1510_v31, %v1509_v28  ;;  %v1500_v36 = vadd.f32 %v1499_v34, %v1498_v32 }
 0x8ea   : > { %v1512_v37 = vrot.slane %v1511_v35, 2  ;;  %v1501_v33 = vrot.slane %v1500_v36, 4 }
 0x8ec   : > { %v1502_v38 = vadd.f32 %v1501_v33, %v1500_v36  ;;  %v1513_v39 = vadd.f32 %v1512_v37, %v1511_v35 }
 0x8ee   : > { %v1503_v40 = vrot.slane %v1502_v38, 2  ;;  %v1514_v41 = vrot.slane %v1513_v39, 1 }
 0x8f0   : > { %v1504_v42 = vadd.f32 %v1503_v40, %v1502_v38  ;;  %v1515_v43 = vadd.f32 %v1514_v41, %v1513_v39 }
 0x8f2   : > { %v1505_v45 = vrot.slane %v1504_v42, 1  ;;  %v1521_v46 = vadd.f32 %v1517_v44, %v1515_v43 }
 0x8f4   : > { %v1506_v47 = vadd.f32 %v1505_v45, %v1504_v42  ;;  %v1527_v48 = vpack.c.bf16 %v1521_v46, %v1521_v46 }
 0x8f6   : > { %v1520_v50 = vadd.f32 %v3402_v49, %v1506_v47  ;;  %v1538_v51 = vunpack.c.l.b16 %v1527_v48  ;;  %v2258_v49 = vld [vmem:[%s3592_s6 + $0x8] sm:$0xff]   ;;  %s3449_s6 = scalar_lea.hbm %s3595_s5, %s1949_s17 }
 0x8f7   : > { %2048 = vmatpush3.bf16.msra.mxu0 %v2258_v49 }
 0x8f8   : > { %v1526_v52 = vpack.c.bf16 %v1520_v50, %v1520_v50  ;;  %v1539_v54 = vrot.slane %v1538_v51, 7 }
 0x8fa   : > { %v1537_v53 = vunpack.c.l.b16 %v1526_v52 }
 0x8fc   : > { %v1541_v55 = vsel %vm1540_vm6, %v1539_v54, %v1537_v53 }
 0x8fd   : > { %v1542_v56 = vpack.c.b16 %v1541_v55, %v1541_v55 }
 0x8ff   : > { %2042 = vmatmul.mubr.msk.bf16.vlgmr.msra.gmra.mrb[8].mxu1 %vm1029_vm4, %v1542_v56 }
 0x9d2   : > { %v1592_v60 = vpop.f32.mrb[8].mxu1 }
 0x9d3   : > { %v1593_v61 = vadd.f32 %v1940_v59, %v1592_v60  ;;  %v2043_v62 = vpop.f32.mrb[9].mxu1 }
 0x9d4   : > { %v1595_v63 = vpop.f32.mrb[10].mxu1 }
 0x9d5   : > { %2289 = vtanh.f32 %v1593_v61  ;;  %v2044_v0 = vpop.f32.mrb[11].mxu1 }
 0x9df   : > { %v2290_v1 = vpop.eup %2289 }
 0x9e0   : > { %1599 = vst.msk [vmem:[#allocation4] sm:$0x3] %vm1231_vm5, %v2290_v1  ;;  %v1604_v2 = vpack.c.bf16 %v2290_v1, %v2290_v1 }
 0x9e2   : > { %2050 = vmatmul.mubr.msk.bf16.vlgmr.msra.gmra.mrb[12].mxu0 %vm1029_vm4, %v1604_v2 }
 0xab5   : > { %v1661_v3 = vpop.f32.mrb[12].mxu0 }
 0xab6   : > { %v1662_v4 = vadd.f32 %v1944_v57, %v1661_v3  ;;  %v2051_v5 = vpop.f32.mrb[13].mxu0 }
 0xab7   : > { %v1664_v6 = vpop.f32.mrb[14].mxu0 }
 0xab8   : > { %1667 = vst [vmem:[%s3328_s29] sm:$0x3] %v1662_v4  ;;  %v2052_v7 = vpop.f32.mrb[15].mxu0 }
 0xab9   : > { %2698 = shalt.err (!%p2695_p10)
}
 0xaba   : > { %s2699_s3 = scalar_lea.hbm %s3449_s6, 32  ;;  %s2703_s17 = scalar_lea.hbm %s3595_s5, 192 }
 0xabb   : > { %p2700_p1 = scmp.ne.s32.totalorder %s3449_s6, %s2699_s3  ;;  %p2704_p13 = scmp.lt.u32.totalorder %s3449_s6, %s3595_s5 }
 0xabc   : > { %p2705_p4 = scmp.lt.u32.totalorder %s2703_s17, %s2699_s3  ;;  %p2707_p9 = scmp.lt.u32.totalorder %s2699_s3, %s3449_s6 }
 0xabd   : > { %p2701_p11 = pnand %p2700_p1, %p3596_p3 }
 0xabe   : > { %p2706_p6 = por %p2705_p4, %p2704_p13 }
 0xabf   : > { %p2702_p12 = pneg %p2701_p11 }
 0xac0   : > { %p2708_p8 = por %p2707_p9, %p2706_p6 }
 0xac2   : > { %p2709_p0 = pnand %p2708_p8, %p2702_p12 }
 0xac4   : > { %2712 = shalt.err (!%p2709_p0)
}
 0xac5   : > { %2107 = dma.vmem_to_hbm [thread:$0]  (%p3596_p3), %s3451_s0, 32, %s3449_s6, %s1669_s25  }
 0xac6 PF: > { %s3597_s15 = sld [smem:[#allocation40_spill]]  ;;  %p2184_p5 = scmp.ge.s32.totalorder %s2779_s21, 2 }
 0xac7   : > { %p3598_p2 = scmp.ne.s32.totalorder %s3567_s28, 0 }
 0xac9   : > { %p2154_p7 = pnand %p2184_p5, %p3598_p2 }
 0xacc   : > { %s1694_s4 = sand.u32 1, %s3597_s15  }
 0xacd   : > { %s1695_s27 = scalar_lea.sflag [#allocation9], %s1694_s4 }
 0xace   : > { %2762 = dma.done.wait (!%p2154_p7), %s1695_s27, 32  }
 0xacf   : > { %2764 = vsyncadd (!%p2154_p7), %s1695_s27, 4294967264  ;;  %p39_p10 = scmp.ge.s32.totalorder %s3220_s24, 8   ;;  %s3599_s0 = smov %s2771_s30 }
 0xad0   : > { %s3600_s30 = smov %s2775_s20  ;;  %s3601_s20 = smov %s3232_s19 }
 0xad1   : > { %s3602_s21 = smov %s3220_s24  ;;  %41 = sbr.rel (!%p39_p10) target bundleno = 25 (0x19), region = 197 }
 0xad8   :  { %1700 = vsyncpa [#allocation8], 1 }
 0xad9   :  { %1702 = vsyncpa [#allocation8 + $0x1], 1 }
 0xada   :  { %1703 = vsyncpa [#allocation11], 1 }
 0xadb   :  { %1704 = vsyncpa [#allocation14], 1 }
 0xadc   :  { %1705 = vsyncpa [#allocation17], 1 }
 0xadd   :  { %1706 = vsyncpa [#allocation20], 1 }
 0xade   :  { %1707 = vsyncpa [#allocation23], 1 }
 0xadf   :  { %1708 = vsyncpa [#allocation26], 1 }
 0xae0   :  { %1709 = vsyncpa [#allocation29], 1 }
 0xae1   :  { %1710 = vsyncpa [#allocation9], 1 }
 0xae2   :  { %1712 = vsyncpa [#allocation9 + $0x1], 1 }

</bundles_post_ra>
